<compile_context>
chip_gen: v5e
topology: v5e:2x2
jax: 0.10.0
libtpu: 0.0.40
codegen_flags: <defaults>
</compile_context>

<pallas_src>
import jax
import jax.numpy as jnp
from jax.experimental import pallas as pl
from jax.experimental.pallas import tpu as pltpu


def _rpn_kernel(x_ref, wc_ref, wh_ref, bh_ref, reg_ref, cls_ref, xpad_ref):
    # x_ref   : (1, H, W, Cin)      input tile (one batch element, NHWC, unpadded)
    # wc_ref  : (9*Cin, Cout)       3x3 conv weights flattened for im2col
    # wh_ref  : (Cout, 4A + A)      fused [reg | cls] 1x1 head weights
    # bh_ref  : (1, 4A + A)         fused head bias (conv bias folded through)
    # reg_ref : (1, 4A, H*W)        lane-dense NCHW output
    # cls_ref : (1, A, H*W)         lane-dense NCHW output
    # xpad_ref: (H+2, W+2, Cin)     VMEM scratch holding the zero-padded tile
    H, W, Cin = x_ref.shape[1], x_ref.shape[2], x_ref.shape[3]
    A4 = reg_ref.shape[1]

    # Build the 1-pixel halo in VMEM (no HBM-level pad / extra activation pass).
    # Only the border ring is zeroed (re-done every step so correctness does not
    # depend on how the megacore splits the batch grid); the interior is then
    # overwritten with the fresh tile.
    xpad_ref[0:1, :, :] = jnp.zeros((1, W + 2, Cin), jnp.float32)
    xpad_ref[H + 1:H + 2, :, :] = jnp.zeros((1, W + 2, Cin), jnp.float32)
    xpad_ref[:, 0:1, :] = jnp.zeros((H + 2, 1, Cin), jnp.float32)
    xpad_ref[:, W + 1:W + 2, :] = jnp.zeros((H + 2, 1, Cin), jnp.float32)
    xpad_ref[1:H + 1, 1:W + 1, :] = x_ref[0]
    xp = xpad_ref[...]

    # im2col: (H*W, 9*Cin) -> the whole 3x3 conv is a single MXU matmul.
    cols = jnp.concatenate(
        [xp[dy:dy + H, dx:dx + W, :].reshape(H * W, Cin)
         for dy in range(3) for dx in range(3)], axis=1)
    h = jnp.dot(cols, wc_ref[...], preferred_element_type=jnp.float32)  # (H*W, Cout)

    # Fused reg|cls heads: one matmul; biases were pre-folded in the wrapper.
    out = jnp.dot(h, wh_ref[...], preferred_element_type=jnp.float32) + bh_ref[...]
    out_t = out.T  # (4A + A, H*W): lane-dense last dim == NCHW layout

    reg_ref[0] = out_t[:A4, :]
    cls_ref[0] = jax.nn.sigmoid(out_t[A4:, :])


def rpn_forward(x_nchw, params):
    """x_nchw: (B, Cin, H, W) float32. Returns (reg, cls) in NCHW like PyTorch."""
    wc, bc, wr, br, wk, bk = (params["wc"], params["bc"], params["wr"],
                              params["br"], params["wk"], params["bk"])
    B, Cin, H, W = x_nchw.shape
    Cout = wc.shape[3]
    A4 = wr.shape[1]
    A = wk.shape[1]
    HW = H * W

    # Single cheap layout pass NCHW -> NHWC (channels on lanes for the matmuls).
    # No jnp.pad: the halo is handled inside the kernel.
    x_nhwc = jnp.transpose(x_nchw, (0, 2, 3, 1))

    # Wrapper-side constant folding (tiny; done once under jit):
    wc_flat = wc.reshape(9 * Cin, Cout)                           # im2col weights
    w_heads = jnp.concatenate([wr, wk], axis=1)                   # (Cout, 4A + A)
    b_heads = bc @ w_heads + jnp.concatenate([br, bk], axis=1)    # conv bias folded

    cost = pl.CostEstimate(
        flops=2 * B * HW * Cout * (9 * Cin + A4 + A),
        transcendentals=B * HW * A,
        bytes_accessed=4 * (B * HW * Cin + 9 * Cin * Cout + Cout * (A4 + A)
                            + (A4 + A) + B * HW * (A4 + A)),
    )

    reg_flat, cls_flat = pl.pallas_call(
        _rpn_kernel,
        out_shape=(
            jax.ShapeDtypeStruct((B, A4, HW), jnp.float32),
            jax.ShapeDtypeStruct((B, A, HW), jnp.float32),
        ),
        grid_spec=pltpu.PrefetchScalarGridSpec(
            num_scalar_prefetch=0,
            grid=(B,),
            in_specs=[
                pl.BlockSpec((1, H, W, Cin), lambda b: (b, 0, 0, 0)),
                pl.BlockSpec((9 * Cin, Cout), lambda b: (0, 0)),
                pl.BlockSpec((Cout, A4 + A), lambda b: (0, 0)),
                pl.BlockSpec((1, A4 + A), lambda b: (0, 0)),
            ],
            out_specs=[
                pl.BlockSpec((1, A4, HW), lambda b: (b, 0, 0)),
                pl.BlockSpec((1, A, HW), lambda b: (b, 0, 0)),
            ],
            scratch_shapes=[pltpu.VMEM((H + 2, W + 2, Cin), jnp.float32)],
        ),
        compiler_params=pltpu.CompilerParams(
            dimension_semantics=("parallel",)),
        cost_estimate=cost,
    )(x_nhwc, wc_flat, w_heads, b_heads)

    # (B, C, H*W) is already NCHW; reshapes are free (no transpose HBM passes).
    reg = reg_flat.reshape(B, A4, H, W)
    cls = cls_flat.reshape(B, A, H, W)
    return reg, cls


def make_params(key, in_dim, out_dim, n_anchor):
    """Deterministic kaiming-uniform-style init (shapes match nn.Conv2d)."""
    ks = jax.random.split(key, 6)

    def kaiming_uniform(k, shape, fan_in):
        bound = jnp.sqrt(6.0 / fan_in)
        return jax.random.uniform(k, shape, jnp.float32, -bound, bound)

    # PyTorch conv weight is (O, I, kh, kw); we store HWIO for the kernel.
    wc = kaiming_uniform(ks[0], (3, 3, in_dim, out_dim), fan_in=in_dim * 9)
    wr = kaiming_uniform(ks[1], (out_dim, n_anchor * 4), fan_in=out_dim)
    wk = kaiming_uniform(ks[2], (out_dim, n_anchor), fan_in=out_dim)
    bc = kaiming_uniform(ks[3], (1, out_dim), fan_in=in_dim * 9)
    br = kaiming_uniform(ks[4], (1, n_anchor * 4), fan_in=out_dim)
    bk = kaiming_uniform(ks[5], (1, n_anchor), fan_in=out_dim)
    return {"wc": wc, "bc": bc, "wr": wr, "br": br, "wk": wk, "bk": bk}


def rpn_reference(x_nchw, params):
    """Pure-JAX reference (lax conv) for correctness checking."""
    x_nhwc = jnp.transpose(x_nchw, (0, 2, 3, 1))
    h = jax.lax.conv_general_dilated(
        x_nhwc, params["wc"], window_strides=(1, 1), padding="SAME",
        dimension_numbers=("NHWC", "HWIO", "NHWC")) + params["bc"][0]
    reg = jnp.einsum("bhwc,cd->bhwd", h, params["wr"]) + params["br"][0]
    cls = jax.nn.sigmoid(
        jnp.einsum("bhwc,cd->bhwd", h, params["wk"]) + params["bk"][0])
    return (jnp.transpose(reg, (0, 3, 1, 2)), jnp.transpose(cls, (0, 3, 1, 2)))


if __name__ == "__main__":
    B, in_dim, H, W = 2, 4, 16, 16
    out_dim, n_anchor = 32, 3

    key = jax.random.PRNGKey(0)
    kx, kp = jax.random.split(key)
    x = jax.random.normal(kx, (B, in_dim, H, W), jnp.float32)
    params = make_params(kp, in_dim, out_dim, n_anchor)

    reg, cls = rpn_forward(x, params)
    jax.block_until_ready((reg, cls))

    reg_ref, cls_ref = rpn_reference(x, params)
    assert reg.shape == (B, n_anchor * 4, H, W)
    assert cls.shape == (B, n_anchor, H, W)
    assert jnp.allclose(reg, reg_ref, atol=1e-4, rtol=1e-4)
    assert jnp.allclose(cls, cls_ref, atol=1e-5, rtol=1e-4)

    print("KERNEL_OK")
</pallas_src>

<mosaic_0001>
module attributes {stable_mosaic.version = 11 : i64} {
  func.func @_rpn_kernel(%arg0: i32, %arg1: memref<1x16x16x4xf32, #tpu.memory_space<vmem>>, %arg2: memref<36x32xf32, #tpu.memory_space<vmem>>, %arg3: memref<32x15xf32, #tpu.memory_space<vmem>>, %arg4: memref<1x15xf32, #tpu.memory_space<vmem>>, %arg5: memref<1x12x256xf32, #tpu.memory_space<vmem>>, %arg6: memref<1x3x256xf32, #tpu.memory_space<vmem>>, %arg7: memref<18x18x4xf32, #tpu.memory_space<vmem>>) attributes {dimension_semantics = [#tpu.dimension_semantics<parallel>], iteration_bounds = array<i64: 2>, scalar_prefetch = 0 : i64, scratch_operands = 1 : i64, tpu.core_type = #tpu.core_type<tc>, window_params = [{transform_indices = @transform_0, window_bounds = array<i64: 1, 16, 16, 4>}, {pipeline_mode = #tpu.pipeline_mode<synchronous>, transform_indices = @transform_1, window_bounds = array<i64: 36, 32>}, {pipeline_mode = #tpu.pipeline_mode<synchronous>, transform_indices = @transform_2, window_bounds = array<i64: 32, 15>}, {pipeline_mode = #tpu.pipeline_mode<synchronous>, transform_indices = @transform_3, window_bounds = array<i64: 1, 15>}, {transform_indices = @transform_4, window_bounds = array<i64: 1, 12, 256>}, {transform_indices = @transform_5, window_bounds = array<i64: 1, 3, 256>}]} {
    %cst = arith.constant 0.000000e+00 : f32
    %0 = vector.broadcast %cst : f32 to vector<1x18x4xf32>
    %c0 = arith.constant 0 : index
    %c0_0 = arith.constant 0 : index
    %c0_1 = arith.constant 0 : index
    %1 = vector.load %arg7[%c0, %c0_0, %c0_1] : memref<18x18x4xf32, #tpu.memory_space<vmem>>, vector<1x18x4xf32>
    tpu.vector_store %arg7[%c0, %c0_0, %c0_1], %0 {strides = array<i32>} : memref<18x18x4xf32, #tpu.memory_space<vmem>>, vector<1x18x4xf32>,
    %cst_2 = arith.constant 0.000000e+00 : f32
    %2 = vector.broadcast %cst_2 : f32 to vector<1x18x4xf32>
    %c17 = arith.constant 17 : index
    %c0_3 = arith.constant 0 : index
    %c0_4 = arith.constant 0 : index
    %3 = vector.load %arg7[%c17, %c0_3, %c0_4] : memref<18x18x4xf32, #tpu.memory_space<vmem>>, vector<1x18x4xf32>
    tpu.vector_store %arg7[%c17, %c0_3, %c0_4], %2 {strides = array<i32>} : memref<18x18x4xf32, #tpu.memory_space<vmem>>, vector<1x18x4xf32>,
    %cst_5 = arith.constant 0.000000e+00 : f32
    %4 = vector.broadcast %cst_5 : f32 to vector<18x1x4xf32>
    %c0_6 = arith.constant 0 : index
    %c0_7 = arith.constant 0 : index
    %c0_8 = arith.constant 0 : index
    %5 = vector.load %arg7[%c0_6, %c0_7, %c0_8] : memref<18x18x4xf32, #tpu.memory_space<vmem>>, vector<18x1x4xf32>
    tpu.vector_store %arg7[%c0_6, %c0_7, %c0_8], %4 {strides = array<i32>} : memref<18x18x4xf32, #tpu.memory_space<vmem>>, vector<18x1x4xf32>,
    %cst_9 = arith.constant 0.000000e+00 : f32
    %6 = vector.broadcast %cst_9 : f32 to vector<18x1x4xf32>
    %c0_10 = arith.constant 0 : index
    %c17_11 = arith.constant 17 : index
    %c0_12 = arith.constant 0 : index
    %7 = vector.load %arg7[%c0_10, %c17_11, %c0_12] : memref<18x18x4xf32, #tpu.memory_space<vmem>>, vector<18x1x4xf32>
    tpu.vector_store %arg7[%c0_10, %c17_11, %c0_12], %6 {strides = array<i32>} : memref<18x18x4xf32, #tpu.memory_space<vmem>>, vector<18x1x4xf32>,
    %c0_13 = arith.constant 0 : index
    %c0_14 = arith.constant 0 : index
    %c0_15 = arith.constant 0 : index
    %c0_16 = arith.constant 0 : index
    %8 = vector.load %arg1[%c0_13, %c0_14, %c0_15, %c0_16] : memref<1x16x16x4xf32, #tpu.memory_space<vmem>>, vector<1x16x16x4xf32>
    %9 = vector.shape_cast %8 : vector<1x16x16x4xf32> to vector<16x16x4xf32>
    %c1 = arith.constant 1 : index
    %c1_17 = arith.constant 1 : index
    %c0_18 = arith.constant 0 : index
    %10 = vector.load %arg7[%c1, %c1_17, %c0_18] : memref<18x18x4xf32, #tpu.memory_space<vmem>>, vector<16x16x4xf32>
    tpu.vector_store %arg7[%c1, %c1_17, %c0_18], %9 {strides = array<i32>} : memref<18x18x4xf32, #tpu.memory_space<vmem>>, vector<16x16x4xf32>,
    %c0_19 = arith.constant 0 : index
    %c0_20 = arith.constant 0 : index
    %c0_21 = arith.constant 0 : index
    %11 = vector.load %arg7[%c0_19, %c0_20, %c0_21] : memref<18x18x4xf32, #tpu.memory_space<vmem>>, vector<18x18x4xf32>
    %12 = vector.extract_strided_slice %11 {offsets = [0, 0, 0], sizes = [16, 16, 4], strides = [1, 1, 1]} : vector<18x18x4xf32> to vector<16x16x4xf32>
    %13 = vector.shape_cast %12 : vector<16x16x4xf32> to vector<256x4xf32>
    %14 = vector.extract_strided_slice %11 {offsets = [0, 1, 0], sizes = [16, 16, 4], strides = [1, 1, 1]} : vector<18x18x4xf32> to vector<16x16x4xf32>
    %15 = vector.shape_cast %14 : vector<16x16x4xf32> to vector<256x4xf32>
    %16 = vector.extract_strided_slice %11 {offsets = [0, 2, 0], sizes = [16, 16, 4], strides = [1, 1, 1]} : vector<18x18x4xf32> to vector<16x16x4xf32>
    %17 = vector.shape_cast %16 : vector<16x16x4xf32> to vector<256x4xf32>
    %18 = vector.extract_strided_slice %11 {offsets = [1, 0, 0], sizes = [16, 16, 4], strides = [1, 1, 1]} : vector<18x18x4xf32> to vector<16x16x4xf32>
    %19 = vector.shape_cast %18 : vector<16x16x4xf32> to vector<256x4xf32>
    %20 = vector.extract_strided_slice %11 {offsets = [1, 1, 0], sizes = [16, 16, 4], strides = [1, 1, 1]} : vector<18x18x4xf32> to vector<16x16x4xf32>
    %21 = vector.shape_cast %20 : vector<16x16x4xf32> to vector<256x4xf32>
    %22 = vector.extract_strided_slice %11 {offsets = [1, 2, 0], sizes = [16, 16, 4], strides = [1, 1, 1]} : vector<18x18x4xf32> to vector<16x16x4xf32>
    %23 = vector.shape_cast %22 : vector<16x16x4xf32> to vector<256x4xf32>
    %24 = vector.extract_strided_slice %11 {offsets = [2, 0, 0], sizes = [16, 16, 4], strides = [1, 1, 1]} : vector<18x18x4xf32> to vector<16x16x4xf32>
    %25 = vector.shape_cast %24 : vector<16x16x4xf32> to vector<256x4xf32>
    %26 = vector.extract_strided_slice %11 {offsets = [2, 1, 0], sizes = [16, 16, 4], strides = [1, 1, 1]} : vector<18x18x4xf32> to vector<16x16x4xf32>
    %27 = vector.shape_cast %26 : vector<16x16x4xf32> to vector<256x4xf32>
    %28 = vector.extract_strided_slice %11 {offsets = [2, 2, 0], sizes = [16, 16, 4], strides = [1, 1, 1]} : vector<18x18x4xf32> to vector<16x16x4xf32>
    %29 = vector.shape_cast %28 : vector<16x16x4xf32> to vector<256x4xf32>
    %30 = tpu.concatenate %13, %15, %17, %19, %21, %23, %25, %27, %29 in 1 : vector<256x4xf32>, vector<256x4xf32>, vector<256x4xf32>, vector<256x4xf32>, vector<256x4xf32>, vector<256x4xf32>, vector<256x4xf32>, vector<256x4xf32>, vector<256x4xf32> -> vector<256x36xf32>
    %c0_22 = arith.constant 0 : index
    %c0_23 = arith.constant 0 : index
    %31 = vector.load %arg2[%c0_22, %c0_23] : memref<36x32xf32, #tpu.memory_space<vmem>>, vector<36x32xf32>
    %cst_24 = arith.constant dense<0.000000e+00> : vector<256x32xf32>
    %32 = tpu.matmul %30, %31, %cst_24 {dimension_numbers = #tpu.dot_dimension_numbers<[1], [0], [0], [1], [0, 0, 1, 1], [], []>} : vector<256x36xf32>, vector<36x32xf32>, vector<256x32xf32> -> vector<256x32xf32>
    %c0_25 = arith.constant 0 : index
    %c0_26 = arith.constant 0 : index
    %33 = vector.load %arg3[%c0_25, %c0_26] : memref<32x15xf32, #tpu.memory_space<vmem>>, vector<32x15xf32>
    %cst_27 = arith.constant dense<0.000000e+00> : vector<256x15xf32>
    %34 = tpu.matmul %32, %33, %cst_27 {dimension_numbers = #tpu.dot_dimension_numbers<[1], [0], [0], [1], [0, 0, 1, 1], [], []>} : vector<256x32xf32>, vector<32x15xf32>, vector<256x15xf32> -> vector<256x15xf32>
    %c0_28 = arith.constant 0 : index
    %c0_29 = arith.constant 0 : index
    %35 = vector.load %arg4[%c0_28, %c0_29] : memref<1x15xf32, #tpu.memory_space<vmem>>, vector<1x15xf32>
    %36 = vector.broadcast %35 : vector<1x15xf32> to vector<256x15xf32>
    %37 = arith.addf %34, %36 : vector<256x15xf32>
    %38 = tpu.transpose %37, [1, 0] : vector<256x15xf32> -> vector<15x256xf32>
    %39 = vector.extract_strided_slice %38 {offsets = [0, 0], sizes = [12, 256], strides = [1, 1]} : vector<15x256xf32> to vector<12x256xf32>
    %c0_30 = arith.constant 0 : index
    %c0_31 = arith.constant 0 : index
    %c0_32 = arith.constant 0 : index
    %40 = vector.load %arg5[%c0_30, %c0_31, %c0_32] : memref<1x12x256xf32, #tpu.memory_space<vmem>>, vector<1x12x256xf32>
    %41 = vector.shape_cast %40 : vector<1x12x256xf32> to vector<12x256xf32>
    %42 = vector.shape_cast %39 : vector<12x256xf32> to vector<1x12x256xf32>
    tpu.vector_store %arg5[%c0_30, %c0_31, %c0_32], %42 {strides = array<i32>} : memref<1x12x256xf32, #tpu.memory_space<vmem>>, vector<1x12x256xf32>,
    %43 = vector.extract_strided_slice %38 {offsets = [12, 0], sizes = [3, 256], strides = [1, 1]} : vector<15x256xf32> to vector<3x256xf32>
    %44 = arith.negf %43 : vector<3x256xf32>
    %45 = math.exp %44 : vector<3x256xf32>
    %cst_33 = arith.constant 1.000000e+00 : f32
    %46 = vector.broadcast %cst_33 : f32 to vector<3x256xf32>
    %47 = arith.addf %46, %45 : vector<3x256xf32>
    %48 = arith.divf %46, %47 : vector<3x256xf32>
    %c0_34 = arith.constant 0 : index
    %c0_35 = arith.constant 0 : index
    %c0_36 = arith.constant 0 : index
    %49 = vector.load %arg6[%c0_34, %c0_35, %c0_36] : memref<1x3x256xf32, #tpu.memory_space<vmem>>, vector<1x3x256xf32>
    %50 = vector.shape_cast %49 : vector<1x3x256xf32> to vector<3x256xf32>
    %51 = vector.shape_cast %48 : vector<3x256xf32> to vector<1x3x256xf32>
    tpu.vector_store %arg6[%c0_34, %c0_35, %c0_36], %51 {strides = array<i32>} : memref<1x3x256xf32, #tpu.memory_space<vmem>>, vector<1x3x256xf32>,
    return
  }
  func.func @transform_0(%arg0: i32) -> (i32, i32, i32, i32) {
    %c0_i32 = arith.constant 0 : i32
    %c0_i32_0 = arith.constant 0 : i32
    %c0_i32_1 = arith.constant 0 : i32
    %c0_i32_2 = arith.constant 0 : i32
    return %arg0, %c0_i32, %c0_i32_0, %c0_i32_1 : i32, i32, i32, i32
  }
  func.func @transform_1(%arg0: i32) -> (i32, i32) {
    %c0_i32 = arith.constant 0 : i32
    %c0_i32_0 = arith.constant 0 : i32
    %c0_i32_1 = arith.constant 0 : i32
    return %c0_i32, %c0_i32_0 : i32, i32
  }
  func.func @transform_2(%arg0: i32) -> (i32, i32) {
    %c0_i32 = arith.constant 0 : i32
    %c0_i32_0 = arith.constant 0 : i32
    %c0_i32_1 = arith.constant 0 : i32
    return %c0_i32, %c0_i32_0 : i32, i32
  }
  func.func @transform_3(%arg0: i32) -> (i32, i32) {
    %c0_i32 = arith.constant 0 : i32
    %c0_i32_0 = arith.constant 0 : i32
    %c0_i32_1 = arith.constant 0 : i32
    return %c0_i32, %c0_i32_0 : i32, i32
  }
  func.func @transform_4(%arg0: i32) -> (i32, i32, i32) {
    %c0_i32 = arith.constant 0 : i32
    %c0_i32_0 = arith.constant 0 : i32
    %c0_i32_1 = arith.constant 0 : i32
    return %arg0, %c0_i32, %c0_i32_0 : i32, i32, i32
  }
  func.func @transform_5(%arg0: i32) -> (i32, i32, i32) {
    %c0_i32 = arith.constant 0 : i32
    %c0_i32_0 = arith.constant 0 : i32
    %c0_i32_1 = arith.constant 0 : i32
    return %arg0, %c0_i32, %c0_i32_0 : i32, i32, i32
  }
}

</mosaic_0001>

<bundles_post_ra>
// kernel: tpu_custom_call.1
= control target key start
LH: loop header
LB: loop body
LE: loop exit
PB: predicated region body
PF: predicated region fallthrough
CT: control target
= control target key end

     0   :  { %s2507_s18 = smov 0   ;;  %s4395_s0 = inlined_call_operand.vmem [shape: f32[2,16,16,4], index: 0, kind: input, shape index: {}]   ;;  %s4396_s1 = inlined_call_operand.vmem [shape: f32[36,32], index: 1, kind: input, shape index: {}]   ;;  %s4397_s2 = inlined_call_operand.vmem [shape: f32[32,15], index: 2, kind: input, shape index: {}]   ;;  %s4398_s3 = inlined_call_operand.vmem [shape: f32[1,15], index: 3, kind: input, shape index: {}]   ;;  %s4399_s4 = inlined_call_operand.vmem [shape: f32[2,12,256], index: 4, kind: output, shape index: {0}]   ;;  %s4400_s5 = inlined_call_operand.vmem [shape: f32[2,3,256], index: 5, kind: output, shape index: {1}]  }
   0x1 LB: > { %s2308_s19 = sadd.s32 4294967295, %s2466_s18   ;;  %p2312_p0 = scmp.ge.s32.totalorder %s2466_s18, 1  ;;  %s2466_s18 = sphi %s2507_s18, %s16_s18  }
   0x2   : > { %p190_p1 = scmp.lt.s32.totalorder %s2466_s18, 3 }
   0x4   : > { %p191_p2 = pnand %p2312_p0, %p190_p1 }
   0x6   : > { %194 = sbr.rel (%p191_p2) target bundleno = 1249 (0x4e1), region = 36 }
   0xb   : > { %vm238_vm0 = vcmask 31744   ;;  %vm247_vm1 = vcmask 24576   ;;  %v2468_v0 = vmov 0.0   ;;  %vm451_vm2 = vcmask 1046528   ;;  %s2469_s20 = smov 4   ;;  %p223_p3 = scmp.lt.s32.totalorder %s2308_s19, 1 }
   0xc   : > { %239 = vst.msk [vmem:[#allocation2] sm:$0xff] %vm238_vm0, %v2468_v0  ;;  %vm241_vm3 = vcmask 25600   ;;  %vm532_vm4 = vcmask 1045504   ;;  %s2470_s25 = smov 8   ;;  %s2471_s26 = smov 12   ;;  %vm1772_vm5 = vcmask 1043456  }
   0xd   : > { %240 = vst.msk [vmem:[#allocation2 + $0x8] sm:$0xff] %vm238_vm0, %v2468_v0  ;;  %s4735_s19 = smov (!%p223_p3, %s2308_s19), 1  ;;  %s2472_s27 = smov 16   ;;  %vm1439_vm6 = vcmask 64512   ;;  %vm1472_vm7 = vcmask 97280   ;;  %vm1538_vm8 = vcmask 162816  }
   0xe   : > { %248 = vst.msk [vmem:[#allocation2] sm:$0x1] %vm247_vm1, %v2468_v0  ;;  %s2388_s21 = sshll.u32 %s4735_s19, 8  ;;  %s2473_s28 = smov 20   ;;  %vm1505_vm9 = vcmask 130048   ;;  %vm1571_vm10 = vcmask 195584  }
   0xf   : > { %244 = vst.msk [vmem:[#allocation2 + $0x198] sm:$0xff] %vm238_vm0, %v2468_v0  ;;  %s2599_s24 = scalar_lea.vmem %s4395_s0, %s2388_s21  ;;  %s2474_s29 = smov 24   ;;  %vm1604_vm11 = vcmask 228352   ;;  %vm1637_vm12 = vcmask 261120   ;;  %vm1675_vm13 = vcmask 293888  }
  0x10   : > { %245 = vst.msk [vmem:[#allocation2 + $0x1a0] sm:$0xff] %vm238_vm0, %v2468_v0  ;;  %v286_v6 = vld [vmem:[%s2599_s24 + $0x10] sm:$0xff]  ;;  %v287_v7 = vld [vmem:[%s2599_s24 + $0x18] sm:$0xff]  ;;  %v284_v8 = vld [vmem:[%s2599_s24] sm:$0xff]  ;;  %s2475_s30 = smov 32   ;;  %s2476_s6 = smov 28  }
  0x11   : > { %249 = vst.msk [vmem:[#allocation2 + $0x18] sm:$0x1] %vm247_vm1, %v2468_v0  ;;  %v285_v9 = vld [vmem:[%s2599_s24 + $0x8] sm:$0xff]  ;;  %v288_v10 = vld [vmem:[%s2599_s24 + $0x20] sm:$0xff]  ;;  %v290_v15 = vld [vmem:[%s2599_s24 + $0x30] sm:$0xff]  ;;  %s2390_s8 = sshll.u32 %s4735_s19, 3 }
  0x12   : > { %250 = vst.msk [vmem:[#allocation2 + $0x30] sm:$0x1] %vm247_vm1, %v2468_v0  ;;  %v289_v12 = vld [vmem:[%s2599_s24 + $0x28] sm:$0xff]  ;;  %v291_v17 = vld [vmem:[%s2599_s24 + $0x38] sm:$0xff]  ;;  %v292_v20 = vld [vmem:[%s2599_s24 + $0x40] sm:$0xff]  ;;  %s237_s11 = scalar_lea.vmem %s4400_s5, %s2390_s8 }
  0x13   : > { %251 = vst.msk [vmem:[#allocation2 + $0x48] sm:$0x1] %vm247_vm1, %v2468_v0  ;;  %v293_v24 = vld [vmem:[%s2599_s24 + $0x48] sm:$0xff]  ;;  %v294_v26 = vld [vmem:[%s2599_s24 + $0x50] sm:$0xff]  ;;  %v295_v27 = vld [vmem:[%s2599_s24 + $0x58] sm:$0xff] }
  0x14   : > { %v2531_v1 = vld [vmem:[#allocation2 + $0x8] sm:$0xff]  ;;  %252 = vst.msk [vmem:[#allocation2 + $0x60] sm:$0x1] %vm247_vm1, %v2468_v0  ;;  %v296_v33 = vld [vmem:[%s2599_s24 + $0x60] sm:$0xff]  ;;  %v297_v34 = vld [vmem:[%s2599_s24 + $0x68] sm:$0xff] }
  0x15   : > { %v2535_v2 = vld [vmem:[#allocation2] sm:$0xff]  ;;  %v453_v3 = vrot.slane %v2531_v1, 1  ;;  %253 = vst.msk [vmem:[#allocation2 + $0x78] sm:$0x1] %vm247_vm1, %v2468_v0  ;;  %v298_v38 = vld [vmem:[%s2599_s24 + $0x70] sm:$0xff]  ;;  %v299_v41 = vld [vmem:[%s2599_s24 + $0x78] sm:$0xff] }
  0x16   : > { %v452_v4 = vrot.slane %v2535_v2, 1  ;;  %254 = vst.msk [vmem:[#allocation2 + $0x90] sm:$0x1] %vm247_vm1, %v2468_v0  ;;  %v300_v45 = vld [vmem:[%s2599_s24 + $0x80] sm:$0xff]  ;;  %v301_v47 = vld [vmem:[%s2599_s24 + $0x88] sm:$0xff]  ;;  %v302_v49 = vld [vmem:[%s2599_s24 + $0x90] sm:$0xff] }
  0x17   : > { %255 = vst.msk [vmem:[#allocation2 + $0xa8] sm:$0x1] %vm247_vm1, %v2468_v0  ;;  %v303_v53 = vld [vmem:[%s2599_s24 + $0x98] sm:$0xff]  ;;  %v304_v61 = vld [vmem:[%s2599_s24 + $0xa0] sm:$0xff]  ;;  %v305_v63 = vld [vmem:[%s2599_s24 + $0xa8] sm:$0xff] }
  0x18   : > { %v454_v5 = vsel %vm451_vm2, %v452_v4, %v453_v3  ;;  %256 = vst.msk [vmem:[#allocation2 + $0xc0] sm:$0x1] %vm247_vm1, %v2468_v0 }
  0x19   : > { %639 = vrot.lane.b32.xlu0 %v454_v5, %s2469_s20  ;;  %257 = vst.msk [vmem:[#allocation2 + $0xd8] sm:$0x1] %vm247_vm1, %v2468_v0 }
  0x1a   : > { %258 = vst.msk [vmem:[#allocation2 + $0xf0] sm:$0x1] %vm247_vm1, %v2468_v0 }
  0x1b   : > { %259 = vst.msk [vmem:[#allocation2 + $0x108] sm:$0x1] %vm247_vm1, %v2468_v0 }
  0x1c   : > { %260 = vst.msk [vmem:[#allocation2 + $0x120] sm:$0x1] %vm247_vm1, %v2468_v0 }
  0x1d   : > { %261 = vst.msk [vmem:[#allocation2 + $0x138] sm:$0x1] %vm247_vm1, %v2468_v0 }
  0x1e   : > { %262 = vst.msk [vmem:[#allocation2 + $0x150] sm:$0x1] %vm247_vm1, %v2468_v0 }
  0x1f   : > { %263 = vst.msk [vmem:[#allocation2 + $0x168] sm:$0x1] %vm247_vm1, %v2468_v0 }
  0x20   : > { %264 = vst.msk [vmem:[#allocation2 + $0x180] sm:$0x1] %vm247_vm1, %v2468_v0 }
  0x21   : > { %267 = vst.msk [vmem:[#allocation2 + $0x29] sm:$0x1] %vm247_vm1, %v2468_v0 }
  0x22   : > { %268 = vst.msk [vmem:[#allocation2 + $0x41] sm:$0x1] %vm247_vm1, %v2468_v0 }
  0x23   : > { %269 = vst.msk [vmem:[#allocation2 + $0x59] sm:$0x1] %vm247_vm1, %v2468_v0 }
  0x24   : > { %270 = vst.msk [vmem:[#allocation2 + $0x71] sm:$0x1] %vm247_vm1, %v2468_v0 }
  0x25   : > { %271 = vst.msk [vmem:[#allocation2 + $0x89] sm:$0x1] %vm247_vm1, %v2468_v0 }
  0x26   : > { %272 = vst.msk [vmem:[#allocation2 + $0xa1] sm:$0x1] %vm247_vm1, %v2468_v0 }
  0x27   : > { %273 = vst.msk [vmem:[#allocation2 + $0xb9] sm:$0x1] %vm247_vm1, %v2468_v0 }
  0x28   : > { %274 = vst.msk [vmem:[#allocation2 + $0xd1] sm:$0x1] %vm247_vm1, %v2468_v0 }
  0x29   : > { %275 = vst.msk [vmem:[#allocation2 + $0xe9] sm:$0x1] %vm247_vm1, %v2468_v0 }
  0x2a   : > { %276 = vst.msk [vmem:[#allocation2 + $0x101] sm:$0x1] %vm247_vm1, %v2468_v0 }
  0x2b   : > { %277 = vst.msk [vmem:[#allocation2 + $0x119] sm:$0x1] %vm247_vm1, %v2468_v0 }
  0x2c   : > { %278 = vst.msk [vmem:[#allocation2 + $0x131] sm:$0x1] %vm247_vm1, %v2468_v0 }
  0x2d   : > { %279 = vst.msk [vmem:[#allocation2 + $0x149] sm:$0x1] %vm247_vm1, %v2468_v0 }
  0x2e   : > { %280 = vst.msk [vmem:[#allocation2 + $0x161] sm:$0x1] %vm247_vm1, %v2468_v0 }
  0x2f   : > { %281 = vst.msk [vmem:[#allocation2 + $0x179] sm:$0x1] %vm247_vm1, %v2468_v0 }
  0x30   : > { %282 = vst.msk [vmem:[#allocation2 + $0x191] sm:$0x1] %vm247_vm1, %v2468_v0 }
  0x31   : > { %319 = vst.msk [vmem:[#allocation2 + $0x31] sm:$0xff] %vm238_vm0, %v286_v6  ;;  %v306_v6 = vld [vmem:[%s2599_s24 + $0xb0] sm:$0xff] }
  0x32   : > { %320 = vst.msk [vmem:[#allocation2 + $0x39] sm:$0xff] %vm238_vm0, %v287_v7  ;;  %v307_v7 = vld [vmem:[%s2599_s24 + $0xb8] sm:$0xff] }
  0x33   : > { %265 = vst.msk [vmem:[#allocation2 + $0x198] sm:$0x1] %vm247_vm1, %v2468_v0 }
  0x34   : > { %317 = vst.msk [vmem:[#allocation2 + $0x19] sm:$0xff] %vm238_vm0, %v284_v8 }
  0x35   : > { %318 = vst.msk [vmem:[#allocation2 + $0x21] sm:$0xff] %vm238_vm0, %v285_v9 }
  0x36   : > { %242 = vst.msk [vmem:[#allocation2 + $0x10] sm:$0x3] %vm241_vm3, %v2468_v0 }
  0x37   : > { %266 = vst.msk [vmem:[#allocation2 + $0x11] sm:$0x1] %vm247_vm1, %v2468_v0 }
  0x38   : > { %v2625_v11 = vld [vmem:[#allocation2 + $0x30] sm:$0xff]  ;;  %246 = vst.msk [vmem:[#allocation2 + $0x1a8] sm:$0x3] %vm241_vm3, %v2468_v0 }
  0x39   : > { %v2629_v13 = vld [vmem:[#allocation2 + $0x38] sm:$0xff]  ;;  %v462_v14 = vrot.slane %v2625_v11, 1  ;;  %283 = vst.msk [vmem:[#allocation2 + $0x1a9] sm:$0x1] %vm247_vm1, %v2468_v0  ;;  %v2640_v19 = vld [vmem:[#allocation2 + $0x40] sm:$0x3] }
  0x3a   : > { %v463_v16 = vrot.slane %v2629_v13, 1  ;;  %321 = vst.msk [vmem:[#allocation2 + $0x49] sm:$0xff] %vm238_vm0, %v288_v10  ;;  %v465_v29 = vrot.slane %v2640_v19, 1 }
  0x3b   : > { %v2638_v18 = vld [vmem:[#allocation2 + $0x18] sm:$0xff]  ;;  %322 = vst.msk [vmem:[#allocation2 + $0x51] sm:$0xff] %vm238_vm0, %v289_v12 }
  0x3c   : > { %v2645_v21 = vsel %vm451_vm2, %v462_v14, %v463_v16  ;;  %v2647_v22 = vld [vmem:[#allocation2 + $0x20] sm:$0xff]  ;;  %v457_v23 = vrot.slane %v2638_v18, 1  ;;  %323 = vst.msk [vmem:[#allocation2 + $0x61] sm:$0xff] %vm238_vm0, %v290_v15  ;;  %v2661_v30 = vld [vmem:[#allocation2 + $0x28] sm:$0x3]  ;;  %v2684_v39 = vsel %vm451_vm2, %v463_v16, %v465_v29 }
  0x3d   : > { %647 = vrot.lane.b32.xlu2 %v2645_v21, %s2469_s20  ;;  %v458_v25 = vrot.slane %v2647_v22, 1  ;;  %324 = vst.msk [vmem:[#allocation2 + $0x69] sm:$0xff] %vm238_vm0, %v291_v17  ;;  %v460_v36 = vrot.slane %v2661_v30, 1 }
  0x3e   : > { %v2658_v28 = vld [vmem:[#allocation2 + $0x10] sm:$0x3]  ;;  %325 = vst.msk [vmem:[#allocation2 + $0x79] sm:$0xff] %vm238_vm0, %v292_v20  ;;  %v308_v20 = vld [vmem:[%s2599_s24 + $0xc0] sm:$0xff] }
  0x3f   : > { %v2665_v31 = vsel %vm451_vm2, %v457_v23, %v458_v25  ;;  %v455_v32 = vrot.slane %v2658_v28, 1  ;;  %326 = vst.msk [vmem:[#allocation2 + $0x81] sm:$0xff] %vm238_vm0, %v293_v24  ;;  %v2703_v48 = vsel %vm451_vm2, %v458_v25, %v460_v36  ;;  %v309_v23 = vld [vmem:[%s2599_s24 + $0xc8] sm:$0xff] }
  0x40   : > { %643 = vrot.lane.b32.xlu1 %v2665_v31, %s2469_s20  ;;  %327 = vst.msk [vmem:[#allocation2 + $0x91] sm:$0xff] %vm238_vm0, %v294_v26 }
  0x41   : > { %v456_v35 = vsel %vm451_vm2, %v453_v3, %v455_v32  ;;  %v2678_v37 = vld [vmem:[#allocation2 + $0x48] sm:$0xff]  ;;  %328 = vst.msk [vmem:[#allocation2 + $0x99] sm:$0xff] %vm238_vm0, %v295_v27 }
  0x42   : > { %641 = vrot.lane.b32.xlu0 %v456_v35, %s2469_s20  ;;  %v2686_v40 = vld [vmem:[#allocation2 + $0x50] sm:$0xff]  ;;  %329 = vst.msk [vmem:[#allocation2 + $0xa9] sm:$0xff] %vm238_vm0, %v296_v33  ;;  %v467_v42 = vrot.slane %v2678_v37, 1  ;;  %v2709_v52 = vld [vmem:[#allocation2 + $0x58] sm:$0x3] }
  0x43   : > { %v468_v43 = vrot.slane %v2686_v40, 1  ;;  %v2692_v44 = vld [vmem:[#allocation2 + $0x60] sm:$0xff]  ;;  %330 = vst.msk [vmem:[#allocation2 + $0xb1] sm:$0xff] %vm238_vm0, %v297_v34  ;;  %v470_v56 = vrot.slane %v2709_v52, 1 }
  0x44   : > { %v2696_v46 = vld [vmem:[#allocation2 + $0x68] sm:$0xff]  ;;  %331 = vst.msk [vmem:[#allocation2 + $0xc1] sm:$0xff] %vm238_vm0, %v298_v38  ;;  %v472_v50 = vrot.slane %v2692_v44, 1  ;;  %v2719_v55 = vld [vmem:[#allocation2 + $0x70] sm:$0x3] }
  0x45   : > { %649 = vrot.lane.b32.xlu2 %v2684_v39, %s2469_s20  ;;  %332 = vst.msk [vmem:[#allocation2 + $0xc9] sm:$0xff] %vm238_vm0, %v299_v41  ;;  %v473_v51 = vrot.slane %v2696_v46, 1  ;;  %v2714_v54 = vsel %vm451_vm2, %v467_v42, %v468_v43  ;;  %v475_v58 = vrot.slane %v2719_v55, 1  ;;  %v2738_v62 = vsel %vm451_vm2, %v468_v43, %v470_v56  ;;  %v2744_v4 = vld [vmem:[#allocation2 + $0x78] sm:$0xff]  ;;  %v310_v41 = vld [vmem:[%s2599_s24 + $0xd0] sm:$0xff]  ;;  %v311_v43 = vld [vmem:[%s2599_s24 + $0xd8] sm:$0xff] }
  0x46   : > { %333 = vst.msk [vmem:[#allocation2 + $0xd9] sm:$0xff] %vm238_vm0, %v300_v45  ;;  %v2730_v59 = vld [vmem:[#allocation2 + $0x80] sm:$0xff]  ;;  %v2732_v60 = vld [vmem:[#allocation2 + $0x88] sm:$0x3]  ;;  %v477_v10 = vrot.slane %v2744_v4, 1 }
  0x47   : > { %334 = vst.msk [vmem:[#allocation2 + $0xe1] sm:$0xff] %vm238_vm0, %v301_v47  ;;  %v2727_v57 = vsel %vm451_vm2, %v472_v50, %v473_v51  ;;  %v478_v0 = vrot.slane %v2730_v59, 1  ;;  %v480_v3 = vrot.slane %v2732_v60, 1  ;;  %v2748_v5 = vsel %vm451_vm2, %v473_v51, %v475_v58  ;;  %v2754_v8 = vld [vmem:[#allocation2 + $0x90] sm:$0xff]  ;;  %v312_v51 = vld [vmem:[%s2599_s24 + $0xe0] sm:$0xff] }
  0x48   : > { %645 = vrot.lane.b32.xlu1 %v2703_v48, %s2469_s20  ;;  %335 = vst.msk [vmem:[#allocation2 + $0xf1] sm:$0xff] %vm238_vm0, %v302_v49  ;;  %v2756_v9 = vld [vmem:[#allocation2 + $0x98] sm:$0xff]  ;;  %v482_v14 = vrot.slane %v2754_v8, 1  ;;  %v2782_v27 = vld [vmem:[#allocation2 + $0xa0] sm:$0x3] }
  0x49   : > { %336 = vst.msk [vmem:[#allocation2 + $0xf9] sm:$0xff] %vm238_vm0, %v303_v53  ;;  %v2764_v12 = vsel %vm451_vm2, %v478_v0, %v480_v3  ;;  %v483_v15 = vrot.slane %v2756_v9, 1  ;;  %v2768_v16 = vld [vmem:[#allocation2 + $0xa8] sm:$0xff]  ;;  %v2777_v24 = vsel %vm451_vm2, %v477_v10, %v478_v0  ;;  %v485_v33 = vrot.slane %v2782_v27, 1  ;;  %v313_v53 = vld [vmem:[%s2599_s24 + $0xe8] sm:$0xff] }
  0x4a   : > { %651 = vrot.lane.b32.xlu0 %v2714_v54, %s2469_s20  ;;  %4484 = vst [vmem:[#allocation3_spill] sm:$0xff] %v2727_v57  ;;  %v2770_v17 = vld [vmem:[#allocation2 + $0xb0] sm:$0xff]  ;;  %v487_v25 = vrot.slane %v2768_v16, 1  ;;  %v2790_v32 = vld [vmem:[#allocation2 + $0xb8] sm:$0x3] }
  0x4b   : > { %337 = vst.msk [vmem:[#allocation2 + $0x109] sm:$0xff] %vm238_vm0, %v304_v61  ;;  %v488_v26 = vrot.slane %v2770_v17, 1  ;;  %v2786_v29 = vsel %vm451_vm2, %v482_v14, %v483_v15  ;;  %v490_v35 = vrot.slane %v2790_v32, 1  ;;  %v2807_v42 = vsel %vm451_vm2, %v483_v15, %v485_v33  ;;  %v2813_v49 = vld [vmem:[#allocation2 + $0xc0] sm:$0xff] }
  0x4c   : > { %338 = vst.msk [vmem:[#allocation2 + $0x111] sm:$0xff] %vm238_vm0, %v305_v63  ;;  %v2799_v36 = vld [vmem:[#allocation2 + $0xc8] sm:$0xff]  ;;  %v2801_v38 = vld [vmem:[#allocation2 + $0xd0] sm:$0x3]  ;;  %v492_v61 = vrot.slane %v2813_v49, 1 }
  0x4d   : > { %655 = vrot.lane.b32.xlu2 %v2727_v57, %s2469_s20  ;;  %4485 = vst [vmem:[#allocation4_spill] sm:$0xff] %v2748_v5  ;;  %v2796_v34 = vsel %vm451_vm2, %v487_v25, %v488_v26  ;;  %v493_v45 = vrot.slane %v2799_v36, 1  ;;  %v495_v47 = vrot.slane %v2801_v38, 1  ;;  %v2817_v50 = vsel %vm451_vm2, %v488_v26, %v490_v35  ;;  %v2823_v56 = vld [vmem:[#allocation2 + $0xd8] sm:$0xff] }
  0x4e   : > { %339 = vst.msk [vmem:[#allocation2 + $0x121] sm:$0xff] %vm238_vm0, %v306_v6  ;;  %v2825_v58 = vld [vmem:[#allocation2 + $0xe0] sm:$0xff]  ;;  %v497_v0 = vrot.slane %v2823_v56, 1 }
  0x4f   : > { %340 = vst.msk [vmem:[#allocation2 + $0x129] sm:$0xff] %vm238_vm0, %v307_v7  ;;  %v2833_v63 = vsel %vm451_vm2, %v493_v45, %v495_v47  ;;  %v498_v3 = vrot.slane %v2825_v58, 1  ;;  %v2837_v6 = vld [vmem:[#allocation2 + $0xf0] sm:$0xff]  ;;  %v2844_v10 = vsel %vm451_vm2, %v492_v61, %v493_v45 }
  0x50   : > { %653 = vrot.lane.b32.xlu1 %v2738_v62, %s2469_s20  ;;  %4486 = vst [vmem:[#allocation5_spill] sm:$0xff] %v2764_v12  ;;  %v2839_v7 = vld [vmem:[#allocation2 + $0xf8] sm:$0xff]  ;;  %v502_v14 = vrot.slane %v2837_v6, 1  ;;  %v2855_v25 = vld [vmem:[#allocation2 + $0x100] sm:$0x3] }
  0x51   : > { %4487 = vst [vmem:[#allocation6_spill] sm:$0xff] %v2777_v24  ;;  %v503_v15 = vrot.slane %v2839_v7, 1  ;;  %v505_v35 = vrot.slane %v2855_v25, 1 }
  0x52   : > { %657 = vrot.lane.b32.xlu0 %v2748_v5, %s2469_s20  ;;  %341 = vst.msk [vmem:[#allocation2 + $0x139] sm:$0xff] %vm238_vm0, %v308_v20  ;;  %v2848_v20 = vld [vmem:[#allocation2 + $0xe8] sm:$0x3] }
  0x53   : > { %342 = vst.msk [vmem:[#allocation2 + $0x141] sm:$0xff] %vm238_vm0, %v309_v23  ;;  %v2851_v23 = vsel %vm451_vm2, %v497_v0, %v498_v3  ;;  %v500_v26 = vrot.slane %v2848_v20, 1  ;;  %v2861_v33 = vsel %vm451_vm2, %v502_v14, %v503_v15  ;;  %v2878_v61 = vsel %vm451_vm2, %v503_v15, %v505_v35 }
  0x54   : > { %4488 = vst [vmem:[#allocation7_spill] sm:$0xff] %v2786_v29 }
  0x55   : > { %661 = vrot.lane.b32.xlu2 %v2764_v12, %s2469_s20  ;;  %4489 = vst [vmem:[#allocation8_spill] sm:$0xff] %v2796_v34  ;;  %v2871_v45 = vsel %vm451_vm2, %v498_v3, %v500_v26  ;;  %v2882_v0 = vld [vmem:[#allocation2 + $0x120] sm:$0xff] }
  0x56   : > { %4490 = vst [vmem:[#allocation9_spill] sm:$0xff] %v2807_v42  ;;  %v2884_v14 = vld [vmem:[#allocation2 + $0x128] sm:$0xff]  ;;  %v512_v26 = vrot.slane %v2882_v0, 1 }
  0x57   : > { %343 = vst.msk [vmem:[#allocation2 + $0x151] sm:$0xff] %vm238_vm0, %v310_v41  ;;  %v2864_v41 = vld [vmem:[#allocation2 + $0x110] sm:$0xff]  ;;  %v513_v15 = vrot.slane %v2884_v14, 1 }
  0x58   : > { %659 = vrot.lane.b32.xlu1 %v2777_v24, %s2469_s20  ;;  %344 = vst.msk [vmem:[#allocation2 + $0x159] sm:$0xff] %vm238_vm0, %v311_v43  ;;  %v2866_v43 = vld [vmem:[#allocation2 + $0x118] sm:$0x3]  ;;  %v508_v47 = vrot.slane %v2864_v41, 1  ;;  %v534_v24 = vrot.slane %v2531_v1, 2 }
  0x59   : > { %4491 = vst [vmem:[#allocation10_spill] sm:$0xff] %v2817_v50  ;;  %v2894_v35 = vld [vmem:[#allocation2 + $0x138] sm:$0xff] }
  0x5a   : > { %663 = vrot.lane.b32.xlu0 %v2786_v29, %s2469_s20  ;;  %345 = vst.msk [vmem:[#allocation2 + $0x169] sm:$0xff] %vm238_vm0, %v312_v51  ;;  %v510_v51 = vrot.slane %v2866_v43, 1 }
  0x5b   : > { %346 = vst.msk [vmem:[#allocation2 + $0x171] sm:$0xff] %vm238_vm0, %v313_v53  ;;  %v2875_v53 = vld [vmem:[#allocation2 + $0x108] sm:$0xff] }
  0x5c   : > { %4492 = vst [vmem:[#allocation11_spill] sm:$0xff] %v2833_v63  ;;  %v2890_v3 = vsel %vm451_vm2, %v508_v47, %v510_v51  ;;  %v2905_v51 = vld [vmem:[#allocation2 + $0x130] sm:$0x3] }
  0x5d   : > { %667 = vrot.lane.b32.xlu2 %v2796_v34, %s2469_s20  ;;  %4493 = vst [vmem:[#allocation12_spill] sm:$0xff] %v2844_v10  ;;  %v515_v34 = vrot.slane %v2905_v51, 1 }
  0x5e   : > { %4494 = vst [vmem:[#allocation13_spill] sm:$0xff] %v2851_v23 }
  0x5f   : > { %4495 = vst [vmem:[#allocation14_spill] sm:$0xff] %v2861_v33  ;;  %v2923_v29 = vld [vmem:[#allocation2 + $0x160] sm:$0x3] }
  0x60   : > { %665 = vrot.lane.b32.xlu1 %v2807_v42, %s2469_s20  ;;  %4496 = vst [vmem:[#allocation15_spill] sm:$0xff] %v2871_v45  ;;  %v525_v42 = vrot.slane %v2923_v29, 1 }
  0x61   : > { %4497 = vst [vmem:[#allocation16_spill] sm:$0xff] %v2878_v61  ;;  %v2939_v12 = vld [vmem:[#allocation2 + $0x168] sm:$0xff] }
  0x62   : > { %669 = vrot.lane.b32.xlu0 %v2817_v50, %s2469_s20  ;;  %4498 = vst [vmem:[#allocation17_spill] sm:$0xff] %v2890_v3  ;;  %v2908_v50 = vsel %vm451_vm2, %v512_v26, %v513_v15  ;;  %v2928_v26 = vsel %vm451_vm2, %v513_v15, %v515_v34  ;;  %v2941_v5 = vld [vmem:[#allocation2 + $0x170] sm:$0xff]  ;;  %v527_v15 = vrot.slane %v2939_v12, 1  ;;  %v2958_v57 = vld [vmem:[#allocation2 + $0x178] sm:$0x3] }
  0x63   : > { %4500 = vst [vmem:[#allocation19_spill] sm:$0xff] %v2908_v50 }
  0x64   : > { %4502 = vst [vmem:[#allocation21_spill] sm:$0xff] %v2928_v26 }
  0x65   : > { %673 = vrot.lane.b32.xlu2 %v2833_v63, %s2469_s20  ;;  %v517_v63 = vrot.slane %v2894_v35, 1 }
  0x68   : > { %671 = vrot.lane.b32.xlu1 %v2844_v10, %s2469_s20  ;;  %v2912_v10 = vld [vmem:[#allocation2 + $0x148] sm:$0x3] }
  0x6a   : > { %675 = vrot.lane.b32.xlu0 %v2851_v23, %s2469_s20  ;;  %v2896_v23 = vld [vmem:[#allocation2 + $0x140] sm:$0xff] }
  0x6d   : > { %679 = vrot.lane.b32.xlu2 %v2861_v33, %s2469_s20  ;;  %v507_v33 = vrot.slane %v2875_v53, 1 }
  0x70   : > { %677 = vrot.lane.b32.xlu1 %v2871_v45, %s2469_s20  ;;  %v2901_v45 = vsel %vm451_vm2, %v507_v33, %v508_v47  ;;  %v520_v47 = vrot.slane %v2912_v10, 1 }
  0x71   : > { %4499 = vst [vmem:[#allocation18_spill] sm:$0xff] %v2901_v45 }
  0x72   : > { %681 = vrot.lane.b32.xlu0 %v2878_v61, %s2469_s20  ;;  %v518_v61 = vrot.slane %v2896_v23, 1 }
  0x74   : > { %v2918_v33 = vsel %vm451_vm2, %v517_v63, %v518_v61  ;;  %v2935_v63 = vsel %vm451_vm2, %v518_v61, %v520_v47  ;;  %v528_v61 = vrot.slane %v2941_v5, 1 }
  0x75   : > { %685 = vrot.lane.b32.xlu2 %v2890_v3, %s2469_s20  ;;  %4501 = vst [vmem:[#allocation20_spill] sm:$0xff] %v2918_v33  ;;  %v2921_v3 = vld [vmem:[#allocation2 + $0x158] sm:$0xff] }
  0x76   : > { %4503 = vst [vmem:[#allocation22_spill] sm:$0xff] %v2935_v63 }
  0x78   : > { %683 = vrot.lane.b32.xlu1 %v2901_v45, %s2469_s20  ;;  %v523_v45 = vrot.slane %v2921_v3, 1 }
  0x7a   : > { %687 = vrot.lane.b32.xlu0 %v2908_v50, %s2469_s20  ;;  %v2932_v50 = vld [vmem:[#allocation2 + $0x150] sm:$0xff]  ;;  %v2947_v34 = vsel %vm451_vm2, %v523_v45, %v525_v42  ;;  %v530_v42 = vrot.slane %v2958_v57, 1 }
  0x7b   : > { %4504 = vst [vmem:[#allocation23_spill] sm:$0xff] %v2947_v34 }
  0x7c   : > { %v2972_v1 = vsel %vm451_vm2, %v528_v61, %v530_v42  ;;  %v549_v42 = vrot.slane %v2686_v40, 2 }
  0x7d   : > { %691 = vrot.lane.b32.xlu2 %v2918_v33, %s2469_s20  ;;  %v522_v33 = vrot.slane %v2932_v50, 1  ;;  %4507 = vst [vmem:[#allocation26_spill] sm:$0xff] %v2972_v1 }
  0x7f   : > { %v2954_v47 = vsel %vm451_vm2, %v522_v33, %v523_v45  ;;  %v539_v33 = vrot.slane %v2647_v22, 2 }
  0x80   : > { %689 = vrot.lane.b32.xlu1 %v2928_v26, %s2469_s20  ;;  %4505 = vst [vmem:[#allocation24_spill] sm:$0xff] %v2954_v47  ;;  %v533_v26 = vrot.slane %v2535_v2, 2  ;;  %v536_v2 = vrot.slane %v2658_v28, 2 }
  0x82   : > { %693 = vrot.lane.b32.xlu0 %v2935_v63, %s2469_s20  ;;  %v2961_v63 = vsel %vm451_vm2, %v527_v15, %v528_v61  ;;  %v535_v45 = vsel %vm532_vm4, %v533_v26, %v534_v24  ;;  %v541_v15 = vrot.slane %v2661_v30, 2  ;;  %v543_v26 = vrot.slane %v2625_v11, 2 }
  0x83   : > { %4506 = vst [vmem:[#allocation25_spill] sm:$0xff] %v2961_v63  ;;  %v544_v61 = vrot.slane %v2629_v13, 2 }
  0x84   : > { %v2982_v28 = vsel %vm532_vm4, %v539_v33, %v541_v15 }
  0x85   : > { %697 = vrot.lane.b32.xlu2 %v2947_v34, %s2469_s20  ;;  %v537_v34 = vsel %vm532_vm4, %v534_v24, %v536_v2  ;;  %v548_v24 = vrot.slane %v2678_v37, 2  ;;  %v546_v2 = vrot.slane %v2640_v19, 2 }
  0x87   : > { %v3010_v15 = vsel %vm532_vm4, %v544_v61, %v546_v2  ;;  %v563_v2 = vrot.slane %v2754_v8, 2 }
  0x88   : > { %695 = vrot.lane.b32.xlu1 %v2954_v47, %s2469_s20 }
  0x8a   : > { %699 = vrot.lane.b32.xlu0 %v2961_v63, %s2469_s20  ;;  %v538_v63 = vrot.slane %v2638_v18, 2 }
  0x8c   : > { %v2989_v30 = vsel %vm532_vm4, %v538_v63, %v539_v33  ;;  %v3004_v63 = vsel %vm532_vm4, %v548_v24, %v549_v42  ;;  %v551_v33 = vrot.slane %v2709_v52, 2  ;;  %v553_v52 = vrot.slane %v2692_v44, 2 }
  0x8d   : > { %735 = vrot.lane.b32.xlu2 %v535_v45, %s2470_s25  ;;  %v558_v24 = vrot.slane %v2744_v4, 2 }
  0x8e   : > { %v3017_v19 = vsel %vm532_vm4, %v549_v42, %v551_v33  ;;  %v564_v33 = vrot.slane %v2756_v9, 2 }
  0x90   : > { %701 = vrot.lane.b32.xlu1 %v2972_v1, %s2469_s20  ;;  %v556_v1 = vrot.slane %v2719_v55, 2  ;;  %v559_v55 = vrot.slane %v2730_v59, 2 }
  0x92   : > { %737 = vrot.lane.b32.xlu0 %v537_v34, %s2470_s25  ;;  %v2996_v34 = vsel %vm532_vm4, %v543_v26, %v544_v61  ;;  %v554_v26 = vrot.slane %v2696_v46, 2 }
  0x94   : > { %v3025_v61 = vsel %vm532_vm4, %v554_v26, %v556_v1  ;;  %v3032_v42 = vsel %vm532_vm4, %v553_v52, %v554_v26  ;;  %v561_v1 = vrot.slane %v2732_v60, 2  ;;  %v3049_v26 = vsel %vm532_vm4, %v563_v2, %v564_v33 }
  0x95   : > { %741 = vrot.lane.b32.xlu2 %v2982_v28, %s2470_s25  ;;  %4510 = vst [vmem:[#allocation29_spill] sm:$0xff] %v3025_v61  ;;  %v566_v52 = vrot.slane %v2782_v27, 2  ;;  %v571_v60 = vrot.slane %v2790_v32, 2  ;;  %v568_v27 = vrot.slane %v2768_v16, 2  ;;  %v573_v32 = vrot.slane %v2813_v49, 2 }
  0x96   : > { %4511 = vst [vmem:[#allocation30_spill] sm:$0xff] %v3032_v42 }
  0x97   : > { %v2993_v45 = vpop.permute.xlu2 %647  ;;  %4515 = vst [vmem:[#allocation34_spill] sm:$0xff] %v3049_v26 }
  0x98   : > { %4508 = vst [vmem:[#allocation27_spill] sm:$0xff] %v2993_v45  ;;  %739 = vrot.lane.b32.xlu1 %v2989_v30, %s2470_s25  ;;  %v3039_v45 = vsel %vm532_vm4, %v558_v24, %v559_v55  ;;  %v3055_v24 = vsel %vm532_vm4, %v559_v55, %v561_v1  ;;  %v574_v1 = vrot.slane %v2799_v36, 2 }
  0x99   : > { %4513 = vst [vmem:[#allocation32_spill] sm:$0xff] %v3039_v45 }
  0x9a   : > { %743 = vrot.lane.b32.xlu0 %v2996_v34, %s2470_s25 }
  0x9d   : > { %747 = vrot.lane.b32.xlu2 %v3004_v63, %s2470_s25 }
  0x9f   : > { %v3014_v47 = vpop.permute.xlu2 %649 }
  0xa0   : > { %4509 = vst [vmem:[#allocation28_spill] sm:$0xff] %v3014_v47  ;;  %745 = vrot.lane.b32.xlu1 %v3010_v15, %s2470_s25 }
  0xa2   : > { %749 = vrot.lane.b32.xlu0 %v3017_v19, %s2470_s25 }
  0xa5   : > { %753 = vrot.lane.b32.xlu2 %v3025_v61, %s2470_s25  ;;  %v3046_v61 = vpop.permute.xlu0 %639 }
  0xa6   : > { %4514 = vst [vmem:[#allocation33_spill] sm:$0xff] %v3046_v61 }
  0xa7   : > { %v3036_v47 = vpop.permute.xlu2 %655 }
  0xa8   : > { %4512 = vst [vmem:[#allocation31_spill] sm:$0xff] %v3036_v47  ;;  %751 = vrot.lane.b32.xlu1 %v3032_v42, %s2470_s25  ;;  %v569_v47 = vrot.slane %v2770_v17, 2 }
  0xaa   : > { %755 = vrot.lane.b32.xlu0 %v3039_v45, %s2470_s25  ;;  %v3062_v45 = vsel %vm532_vm4, %v564_v33, %v566_v52  ;;  %v3072_v55 = vsel %vm532_vm4, %v569_v47, %v571_v60  ;;  %v3081_v33 = vsel %vm532_vm4, %v568_v27, %v569_v47  ;;  %v578_v52 = vrot.slane %v2823_v56, 2 }
  0xab   : > { %4517 = vst [vmem:[#allocation36_spill] sm:$0xff] %v3062_v45  ;;  %v3088_v60 = vsel %vm532_vm4, %v573_v32, %v574_v1  ;;  %v581_v27 = vrot.slane %v2848_v20, 2  ;;  %v583_v20 = vrot.slane %v2837_v6, 2 }
  0xac   : > { %4519 = vst [vmem:[#allocation38_spill] sm:$0xff] %v3072_v55 }
  0xad   : > { %759 = vrot.lane.b32.xlu2 %v3049_v26, %s2470_s25  ;;  %4521 = vst [vmem:[#allocation40_spill] sm:$0xff] %v3081_v33  ;;  %v579_v26 = vrot.slane %v2825_v58, 2 }
  0xae   : > { %4523 = vst [vmem:[#allocation42_spill] sm:$0xff] %v3088_v60 }
  0xaf   : > { %v3059_v42 = vpop.permute.xlu2 %661  ;;  %v3098_v47 = vsel %vm532_vm4, %v578_v52, %v579_v26 }
  0xb0   : > { %4516 = vst [vmem:[#allocation35_spill] sm:$0xff] %v3059_v42  ;;  %757 = vrot.lane.b32.xlu1 %v3055_v24, %s2470_s25 }
  0xb2   : > { %v3067_v2 = vpop.permute.xlu1 %643  ;;  %761 = vrot.lane.b32.xlu0 %v3062_v45, %s2470_s25 }
  0xb3   : > { %4518 = vst [vmem:[#allocation37_spill] sm:$0xff] %v3067_v2  ;;  %v576_v2 = vrot.slane %v2801_v38, 2  ;;  %v584_v38 = vrot.slane %v2839_v7, 2 }
  0xb4   : > { %v3076_v42 = vpop.permute.xlu0 %641 }
  0xb5   : > { %4520 = vst [vmem:[#allocation39_spill] sm:$0xff] %v3076_v42  ;;  %765 = vrot.lane.b32.xlu2 %v3072_v55, %s2470_s25  ;;  %v3106_v32 = vsel %vm532_vm4, %v574_v1, %v576_v2  ;;  %v589_v1 = vrot.slane %v2864_v41, 2 }
  0xb6   : > { %4526 = vst [vmem:[#allocation45_spill] sm:$0xff] %v3106_v32 }
  0xb7   : > { %v3085_v45 = vpop.permute.xlu2 %667 }
  0xb8   : > { %4522 = vst [vmem:[#allocation41_spill] sm:$0xff] %v3085_v45  ;;  %763 = vrot.lane.b32.xlu1 %v3081_v33, %s2470_s25  ;;  %v586_v45 = vrot.slane %v2855_v25, 2  ;;  %v588_v25 = vrot.slane %v2875_v53, 2 }
  0xba   : > { %v3093_v42 = vpop.permute.xlu1 %645  ;;  %767 = vrot.lane.b32.xlu0 %v3088_v60, %s2470_s25  ;;  %v3113_v60 = vsel %vm532_vm4, %v579_v26, %v581_v27  ;;  %v3123_v2 = vsel %vm532_vm4, %v584_v38, %v586_v45  ;;  %v3132_v26 = vsel %vm532_vm4, %v583_v20, %v584_v38  ;;  %v593_v27 = vrot.slane %v2882_v0, 2 }
  0xbb   : > { %4524 = vst [vmem:[#allocation43_spill] sm:$0xff] %v3093_v42  ;;  %v3139_v45 = vsel %vm532_vm4, %v588_v25, %v589_v1  ;;  %v596_v20 = vrot.slane %v2905_v51, 2  ;;  %v598_v51 = vrot.slane %v2894_v35, 2 }
  0xbc   : > { %v3101_v55 = vpop.permute.xlu0 %651  ;;  %4528 = vst [vmem:[#allocation47_spill] sm:$0xff] %v3113_v60 }
  0xbd   : > { %4525 = vst [vmem:[#allocation44_spill] sm:$0xff] %v3101_v55  ;;  %771 = vrot.lane.b32.xlu2 %v3098_v47, %s2470_s25 }
  0xbf   : > { %v3110_v33 = vpop.permute.xlu2 %673 }
  0xc0   : > { %4527 = vst [vmem:[#allocation46_spill] sm:$0xff] %v3110_v33  ;;  %769 = vrot.lane.b32.xlu1 %v3106_v32, %s2470_s25  ;;  %v594_v32 = vrot.slane %v2884_v14, 2 }
  0xc2   : > { %v3118_v52 = vpop.permute.xlu1 %653  ;;  %773 = vrot.lane.b32.xlu0 %v3113_v60, %s2470_s25  ;;  %v3149_v38 = vsel %vm532_vm4, %v593_v27, %v594_v32  ;;  %v3164_v61 = vsel %vm532_vm4, %v594_v32, %v596_v20  ;;  %v608_v20 = vrot.slane %v2939_v12, 2 }
  0xc3   : > { %4529 = vst [vmem:[#allocation48_spill] sm:$0xff] %v3118_v52 }
  0xc4   : > { %v3127_v33 = vpop.permute.xlu0 %657  ;;  %4535 = vst [vmem:[#allocation54_spill] sm:$0xff] %v3164_v61 }
  0xc5   : > { %4530 = vst [vmem:[#allocation49_spill] sm:$0xff] %v3127_v33  ;;  %777 = vrot.lane.b32.xlu2 %v3123_v2, %s2470_s25  ;;  %v591_v33 = vrot.slane %v2866_v43, 2  ;;  %v599_v43 = vrot.slane %v2896_v23, 2 }
  0xc7   : > { %v3136_v52 = vpop.permute.xlu2 %679  ;;  %v3157_v25 = vsel %vm532_vm4, %v589_v1, %v591_v33  ;;  %v604_v1 = vrot.slane %v2921_v3, 2  ;;  %v3183_v32 = vsel %vm532_vm4, %v598_v51, %v599_v43  ;;  %v611_v51 = vrot.slane %v2958_v57, 2 }
  0xc8   : > { %4531 = vst [vmem:[#allocation50_spill] sm:$0xff] %v3136_v52  ;;  %775 = vrot.lane.b32.xlu1 %v3132_v26, %s2470_s25 }
  0xc9   : > { %4539 = vst [vmem:[#allocation58_spill] sm:$0xff] %v3183_v32 }
  0xca   : > { %v3144_v55 = vpop.permute.xlu1 %659  ;;  %779 = vrot.lane.b32.xlu0 %v3139_v45, %s2470_s25 }
  0xcb   : > { %4532 = vst [vmem:[#allocation51_spill] sm:$0xff] %v3144_v55  ;;  %v601_v55 = vrot.slane %v2912_v10, 2  ;;  %v603_v10 = vrot.slane %v2932_v50, 2 }
  0xcc   : > { %v3152_v42 = vpop.permute.xlu0 %663 }
  0xcd   : > { %4533 = vst [vmem:[#allocation52_spill] sm:$0xff] %v3152_v42  ;;  %783 = vrot.lane.b32.xlu2 %v3149_v38, %s2470_s25  ;;  %v3174_v33 = vsel %vm532_vm4, %v599_v43, %v601_v55  ;;  %v3190_v55 = vsel %vm532_vm4, %v603_v10, %v604_v1 }
  0xce   : > { %4537 = vst [vmem:[#allocation56_spill] sm:$0xff] %v3174_v33 }
  0xcf   : > { %v3161_v52 = vpop.permute.xlu2 %685  ;;  %4541 = vst [vmem:[#allocation60_spill] sm:$0xff] %v3190_v55 }
  0xd0   : > { %4534 = vst [vmem:[#allocation53_spill] sm:$0xff] %v3161_v52  ;;  %781 = vrot.lane.b32.xlu1 %v3157_v25, %s2470_s25 }
  0xd2   : > { %v3169_v27 = vpop.permute.xlu1 %665  ;;  %785 = vrot.lane.b32.xlu0 %v3164_v61, %s2470_s25 }
  0xd3   : > { %4536 = vst [vmem:[#allocation55_spill] sm:$0xff] %v3169_v27  ;;  %v609_v27 = vrot.slane %v2941_v5, 2 }
  0xd4   : > { %v3178_v42 = vpop.permute.xlu0 %669 }
  0xd5   : > { %4538 = vst [vmem:[#allocation57_spill] sm:$0xff] %v3178_v42  ;;  %789 = vrot.lane.b32.xlu2 %v3174_v33, %s2470_s25  ;;  %v606_v42 = vrot.slane %v2923_v29, 2  ;;  %v3200_v43 = vsel %vm532_vm4, %v608_v20, %v609_v27  ;;  %v3213_v29 = vsel %vm532_vm4, %v609_v27, %v611_v51 }
  0xd6   : > { %4542 = vst [vmem:[#allocation61_spill] sm:$0xff] %v3200_v43 }
  0xd7   : > { %v3187_v52 = vpop.permute.xlu2 %691  ;;  %v3208_v10 = vsel %vm532_vm4, %v604_v1, %v606_v42  ;;  %4546 = vst [vmem:[#allocation65_spill] sm:$0xff] %v3213_v29 }
  0xd8   : > { %4540 = vst [vmem:[#allocation59_spill] sm:$0xff] %v3187_v52  ;;  %787 = vrot.lane.b32.xlu1 %v3183_v32, %s2470_s25 }
  0xd9   : > { %4544 = vst [vmem:[#allocation63_spill] sm:$0xff] %v3208_v10 }
  0xda   : > { %v3195_v61 = vpop.permute.xlu1 %671  ;;  %791 = vrot.lane.b32.xlu0 %v3190_v55, %s2470_s25  ;;  %v4590_v55 = vld [vmem:[#allocation8_spill] sm:$0xff] }
  0xdc   : > { %v3203_v33 = vpop.permute.xlu0 %675 }
  0xdd   : > { %4543 = vst [vmem:[#allocation62_spill] sm:$0xff] %v3203_v33  ;;  %795 = vrot.lane.b32.xlu2 %v3200_v43, %s2470_s25  ;;  %v4595_v33 = vld [vmem:[#allocation15_spill] sm:$0xff] }
  0xdf   : > { %v3210_v52 = vpop.permute.xlu2 %697 }
  0xe0   : > { %4545 = vst [vmem:[#allocation64_spill] sm:$0xff] %v3210_v52  ;;  %793 = vrot.lane.b32.xlu1 %v3208_v10, %s2470_s25 }
  0xe2   : > { %v3217_v20 = vpop.permute.xlu1 %677  ;;  %797 = vrot.lane.b32.xlu0 %v3213_v29, %s2470_s25 }
  0xe3   : > { %4547 = vst [vmem:[#allocation66_spill] sm:$0xff] %v3217_v20 }
  0xe4   : > { %v3221_v57 = vpop.permute.xlu0 %681 }
  0xe5   : > { %4548 = vst [vmem:[#allocation67_spill] sm:$0xff] %v3221_v57  ;;  %833 = vrot.lane.b32.xlu2 %v2647_v22, %s2471_s26  ;;  %v315_v57 = vld [vmem:[%s2599_s24 + $0xf8] sm:$0xff] }
  0xe6   : > { %348 = vst.msk [vmem:[#allocation2 + $0x189] sm:$0xff] %vm238_vm0, %v315_v57 }
  0xe7   : > { %v3225_v42 = vpop.permute.xlu2 %735 }
  0xe8   : > { %831 = vrot.lane.b32.xlu1 %v2638_v18, %s2471_s26 }
  0xea   : > { %v3229_v27 = vpop.permute.xlu1 %683  ;;  %835 = vrot.lane.b32.xlu0 %v2625_v11, %s2471_s26 }
  0xeb   : > { %4549 = vst [vmem:[#allocation68_spill] sm:$0xff] %v3229_v27 }
  0xec   : > { %v3233_v1 = vpop.permute.xlu0 %687 }
  0xed   : > { %4550 = vst [vmem:[#allocation69_spill] sm:$0xff] %v3233_v1  ;;  %839 = vrot.lane.b32.xlu2 %v2678_v37, %s2471_s26 }
  0xef   : > { %v3237_v51 = vpop.permute.xlu2 %741 }
  0xf0   : > { %837 = vrot.lane.b32.xlu1 %v2629_v13, %s2471_s26 }
  0xf2   : > { %v3241_v22 = vpop.permute.xlu1 %689  ;;  %841 = vrot.lane.b32.xlu0 %v2686_v40, %s2471_s26 }
  0xf3   : > { %4551 = vst [vmem:[#allocation70_spill] sm:$0xff] %v3241_v22 }
  0xf4   : > { %v3245_v18 = vpop.permute.xlu0 %693 }
  0xf5   : > { %4552 = vst [vmem:[#allocation71_spill] sm:$0xff] %v3245_v18  ;;  %845 = vrot.lane.b32.xlu2 %v2696_v46, %s2471_s26 }
  0xf7   : > { %v3249_v52 = vpop.permute.xlu2 %747 }
  0xf8   : > { %843 = vrot.lane.b32.xlu1 %v2692_v44, %s2471_s26 }
  0xfa   : > { %v3253_v1 = vpop.permute.xlu1 %695  ;;  %847 = vrot.lane.b32.xlu0 %v2744_v4, %s2471_s26 }
  0xfb   : > { %4553 = vst [vmem:[#allocation72_spill] sm:$0xff] %v3253_v1 }
  0xfc   : > { %v3257_v22 = vpop.permute.xlu0 %699 }
  0xfd   : > { %4554 = vst [vmem:[#allocation73_spill] sm:$0xff] %v3257_v22  ;;  %851 = vrot.lane.b32.xlu2 %v2754_v8, %s2471_s26 }
  0xff   : > { %v3261_v18 = vpop.permute.xlu2 %753 }
 0x100   : > { %4555 = vst [vmem:[#allocation74_spill] sm:$0xff] %v3261_v18  ;;  %849 = vrot.lane.b32.xlu1 %v2730_v59, %s2471_s26 }
 0x102   : > { %v3265_v29 = vpop.permute.xlu1 %701  ;;  %853 = vrot.lane.b32.xlu0 %v2756_v9, %s2471_s26 }
 0x103   : > { %4556 = vst [vmem:[#allocation75_spill] sm:$0xff] %v3265_v29  ;;  %v314_v29 = vld [vmem:[%s2599_s24 + $0xf0] sm:$0xff] }
 0x104   : > { %v3269_v1 = vpop.permute.xlu0 %737  ;;  %347 = vst.msk [vmem:[#allocation2 + $0x181] sm:$0xff] %vm238_vm0, %v314_v29 }
 0x105   : > { %857 = vrot.lane.b32.xlu2 %v2770_v17, %s2471_s26 }
 0x107   : > { %v3273_v22 = vpop.permute.xlu2 %759 }
 0x108   : > { %4557 = vst [vmem:[#allocation76_spill] sm:$0xff] %v3273_v22  ;;  %855 = vrot.lane.b32.xlu1 %v2768_v16, %s2471_s26 }
 0x10a   : > { %v3277_v27 = vpop.permute.xlu1 %739  ;;  %859 = vrot.lane.b32.xlu0 %v2813_v49, %s2471_s26 }
 0x10c   : > { %v3281_v43 = vpop.permute.xlu0 %743 }
 0x10d   : > { %863 = vrot.lane.b32.xlu2 %v2823_v56, %s2471_s26 }
 0x10f   : > { %v3285_v9 = vpop.permute.xlu2 %765 }
 0x110   : > { %4558 = vst [vmem:[#allocation77_spill] sm:$0xff] %v3285_v9  ;;  %861 = vrot.lane.b32.xlu1 %v2799_v36, %s2471_s26 }
 0x112   : > { %v3293_v16 = vpop.permute.xlu1 %745  ;;  %865 = vrot.lane.b32.xlu0 %v2825_v58, %s2471_s26 }
 0x114   : > { %v3297_v17 = vpop.permute.xlu0 %749 }
 0x115   : > { %4559 = vst [vmem:[#allocation78_spill] sm:$0xff] %v3297_v17  ;;  %869 = vrot.lane.b32.xlu2 %v2839_v7, %s2471_s26  ;;  %v4596_v17 = vld [vmem:[#allocation13_spill] sm:$0xff] }
 0x117   : > { %v3301_v49 = vpop.permute.xlu2 %771 }
 0x118   : > { %4560 = vst [vmem:[#allocation79_spill] sm:$0xff] %v3301_v49  ;;  %867 = vrot.lane.b32.xlu1 %v2837_v6, %s2471_s26 }
 0x11a   : > { %v3305_v36 = vpop.permute.xlu1 %751  ;;  %871 = vrot.lane.b32.xlu0 %v2875_v53, %s2471_s26 }
 0x11b   : > { %4561 = vst [vmem:[#allocation80_spill] sm:$0xff] %v3305_v36 }
 0x11c   : > { %v3309_v56 = vpop.permute.xlu0 %755 }
 0x11d   : > { %4562 = vst [vmem:[#allocation81_spill] sm:$0xff] %v3309_v56  ;;  %875 = vrot.lane.b32.xlu2 %v2882_v0, %s2471_s26 }
 0x11f   : > { %v3313_v58 = vpop.permute.xlu2 %777 }
 0x120   : > { %4563 = vst [vmem:[#allocation82_spill] sm:$0xff] %v3313_v58  ;;  %873 = vrot.lane.b32.xlu1 %v2864_v41, %s2471_s26  ;;  %v4585_v58 = vld [vmem:[#allocation5_spill] sm:$0xff] }
 0x122   : > { %v3317_v29 = vpop.permute.xlu1 %757  ;;  %877 = vrot.lane.b32.xlu0 %v2884_v14, %s2471_s26 }
 0x123   : > { %4564 = vst [vmem:[#allocation83_spill] sm:$0xff] %v3317_v29 }
 0x124   : > { %v3321_v57 = vpop.permute.xlu0 %761 }
 0x125   : > { %4565 = vst [vmem:[#allocation84_spill] sm:$0xff] %v3321_v57  ;;  %881 = vrot.lane.b32.xlu2 %v2896_v23, %s2471_s26 }
 0x127   : > { %v3325_v9 = vpop.permute.xlu2 %783 }
 0x128   : > { %4566 = vst [vmem:[#allocation85_spill] sm:$0xff] %v3325_v9  ;;  %879 = vrot.lane.b32.xlu1 %v2894_v35, %s2471_s26  ;;  %v3345_v35 = vld [vmem:[#allocation2 + $0x188] sm:$0xff] }
 0x129   : > { %4570 = vst [vmem:[#allocation89_spill] sm:$0xff] %v3345_v35 }
 0x12a   : > { %v3329_v22 = vpop.permute.xlu1 %763  ;;  %883 = vrot.lane.b32.xlu0 %v2932_v50, %s2471_s26  ;;  %v3351_v50 = vld [vmem:[#allocation2 + $0x180] sm:$0xff] }
 0x12b   : > { %4567 = vst [vmem:[#allocation86_spill] sm:$0xff] %v3329_v22 }
 0x12c   : > { %v3333_v56 = vpop.permute.xlu0 %767  ;;  %4572 = vst [vmem:[#allocation91_spill] sm:$0xff] %v3351_v50 }
 0x12d   : > { %887 = vrot.lane.b32.xlu2 %v2939_v12, %s2471_s26 }
 0x12f   : > { %v3337_v29 = vpop.permute.xlu2 %789 }
 0x130   : > { %4568 = vst [vmem:[#allocation87_spill] sm:$0xff] %v3337_v29  ;;  %885 = vrot.lane.b32.xlu1 %v2921_v3, %s2471_s26 }
 0x132   : > { %v3341_v23 = vpop.permute.xlu1 %769  ;;  %889 = vrot.lane.b32.xlu0 %v2941_v5, %s2471_s26 }
 0x133   : > { %4569 = vst [vmem:[#allocation88_spill] sm:$0xff] %v3341_v23 }
 0x134   : > { %v3347_v22 = vpop.permute.xlu0 %773 }
 0x135   : > { %4571 = vst [vmem:[#allocation90_spill] sm:$0xff] %v3347_v22  ;;  %893 = vrot.lane.b32.xlu2 %v3345_v35, %s2471_s26 }
 0x137   : > { %v3353_v12 = vpop.permute.xlu2 %795 }
 0x138   : > { %4573 = vst [vmem:[#allocation92_spill] sm:$0xff] %v3353_v12  ;;  %891 = vrot.lane.b32.xlu1 %v3351_v50, %s2471_s26  ;;  %v4579_v50 = vld [vmem:[#allocation3_spill] sm:$0xff] }
 0x13a   : > { %v3357_v3 = vpop.permute.xlu1 %775  ;;  %927 = vrot.lane.b32.xlu0 %v2665_v31, %s2472_s27 }
 0x13b   : > { %4574 = vst [vmem:[#allocation93_spill] sm:$0xff] %v3357_v3 }
 0x13c   : > { %v3361_v5 = vpop.permute.xlu0 %779 }
 0x13d   : > { %4575 = vst [vmem:[#allocation94_spill] sm:$0xff] %v3361_v5  ;;  %931 = vrot.lane.b32.xlu2 %v2645_v21, %s2472_s27 }
 0x13f   : > { %v3365_v29 = vpop.permute.xlu2 %833 }
 0x140   : > { %929 = vrot.lane.b32.xlu1 %v2703_v48, %s2472_s27 }
 0x142   : > { %v3369_v12 = vpop.permute.xlu1 %781  ;;  %933 = vrot.lane.b32.xlu0 %v2684_v39, %s2472_s27 }
 0x143   : > { %4576 = vst [vmem:[#allocation95_spill] sm:$0xff] %v3369_v12  ;;  %v4581_v12 = vld [vmem:[#allocation6_spill] sm:$0xff] }
 0x144   : > { %v3373_v57 = vpop.permute.xlu0 %785 }
 0x145   : > { %4577 = vst [vmem:[#allocation96_spill] sm:$0xff] %v3373_v57  ;;  %937 = vrot.lane.b32.xlu2 %v2738_v62, %s2472_s27  ;;  %v4583_v57 = vld [vmem:[#allocation4_spill] sm:$0xff] }
 0x147   : > { %v3377_v31 = vpop.permute.xlu2 %839 }
 0x148   : > { %935 = vrot.lane.b32.xlu1 %v2714_v54, %s2472_s27 }
 0x14a   : > { %v3381_v9 = vpop.permute.xlu1 %787  ;;  %939 = vrot.lane.b32.xlu0 %v4579_v50, %s2472_s27 }
 0x14b   : > { %4578 = vst [vmem:[#allocation97_spill] sm:$0xff] %v3381_v9  ;;  %v4587_v9 = vld [vmem:[#allocation9_spill] sm:$0xff] }
 0x14c   : > { %v3385_v48 = vpop.permute.xlu0 %791 }
 0x14d   : > { %4580 = vst [vmem:[#allocation3_spill] sm:$0xff] %v3385_v48  ;;  %943 = vrot.lane.b32.xlu2 %v4581_v12, %s2472_s27  ;;  %v4589_v48 = vld [vmem:[#allocation7_spill] sm:$0xff] }
 0x14f   : > { %v3389_v35 = vpop.permute.xlu2 %845 }
 0x150   : > { %4582 = vst [vmem:[#allocation6_spill] sm:$0xff] %v3389_v35  ;;  %941 = vrot.lane.b32.xlu1 %v4583_v57, %s2472_s27 }
 0x152   : > { %v3393_v5 = vpop.permute.xlu1 %793  ;;  %945 = vrot.lane.b32.xlu0 %v4585_v58, %s2472_s27 }
 0x153   : > { %4584 = vst [vmem:[#allocation4_spill] sm:$0xff] %v3393_v5  ;;  %v4591_v5 = vld [vmem:[#allocation12_spill] sm:$0xff] }
 0x154   : > { %v3397_v10 = vpop.permute.xlu0 %797 }
 0x155   : > { %4586 = vst [vmem:[#allocation5_spill] sm:$0xff] %v3397_v10  ;;  %949 = vrot.lane.b32.xlu2 %v4587_v9, %s2472_s27  ;;  %v4593_v10 = vld [vmem:[#allocation10_spill] sm:$0xff] }
 0x157   : > { %v3401_v18 = vpop.permute.xlu2 %851 }
 0x158   : > { %4588 = vst [vmem:[#allocation9_spill] sm:$0xff] %v3401_v18  ;;  %947 = vrot.lane.b32.xlu1 %v4589_v48, %s2472_s27  ;;  %v4594_v18 = vld [vmem:[#allocation11_spill] sm:$0xff] }
 0x15a   : > { %v3405_v3 = vpop.permute.xlu1 %831  ;;  %951 = vrot.lane.b32.xlu0 %v4590_v55, %s2472_s27 }
 0x15c   : > { %v3409_v36 = vpop.permute.xlu0 %835 }
 0x15d   : > { %955 = vrot.lane.b32.xlu2 %v4591_v5, %s2472_s27 }
 0x15f   : > { %v3413_v22 = vpop.permute.xlu2 %857 }
 0x160   : > { %4592 = vst [vmem:[#allocation7_spill] sm:$0xff] %v3413_v22  ;;  %953 = vrot.lane.b32.xlu1 %v4593_v10, %s2472_s27  ;;  %v4597_v22 = vld [vmem:[#allocation14_spill] sm:$0xff] }
 0x162   : > { %v3417_v20 = vpop.permute.xlu1 %837  ;;  %957 = vrot.lane.b32.xlu0 %v4594_v18, %s2472_s27 }
 0x164   : > { %v3421_v49 = vpop.permute.xlu0 %841 }
 0x165   : > { %961 = vrot.lane.b32.xlu2 %v4595_v33, %s2472_s27  ;;  %v4599_v33 = vld [vmem:[#allocation16_spill] sm:$0xff] }
 0x167   : > { %v3425_v35 = vpop.permute.xlu2 %863 }
 0x168   : > { %959 = vrot.lane.b32.xlu1 %v4596_v17, %s2472_s27 }
 0x16a   : > { %v3429_v5 = vpop.permute.xlu1 %843  ;;  %963 = vrot.lane.b32.xlu0 %v4597_v22, %s2472_s27 }
 0x16c   : > { %v3433_v32 = vpop.permute.xlu0 %847 }
 0x16d   : > { %4598 = vst [vmem:[#allocation8_spill] sm:$0xff] %v3433_v32  ;;  %1023 = vrot.lane.b32.xlu2 %v2989_v30, %s2473_s28 }
 0x16f   : > { %v3437_v18 = vpop.permute.xlu2 %869 }
 0x170   : > { %965 = vrot.lane.b32.xlu1 %v4599_v33, %s2472_s27 }
 0x172   : > { %v3441_v23 = vpop.permute.xlu1 %849  ;;  %1119 = vrot.lane.b32.xlu0 %v2625_v11, %s2474_s29 }
 0x173   : > { %4600 = vst [vmem:[#allocation10_spill] sm:$0xff] %v3441_v23 }
 0x174   : > { %v3445_v17 = vpop.permute.xlu0 %853 }
 0x175   : > { %4601 = vst [vmem:[#allocation14_spill] sm:$0xff] %v3445_v17  ;;  %1311 = vrot.lane.b32.xlu2 %v2996_v34, %s2475_s30 }
 0x177   : > { %v3449_v32 = vpop.permute.xlu2 %875 }
 0x178   : > { %4602 = vst [vmem:[#allocation16_spill] sm:$0xff] %v3449_v32  ;;  %1215 = vrot.lane.b32.xlu1 %v2645_v21, %s2476_s6 }
 0x17a   : > { %v3453_v30 = vpop.permute.xlu1 %855  ;;  %1025 = vrot.lane.b32.xlu0 %v2982_v28, %s2473_s28 }
 0x17b   : > { %4603 = vst [vmem:[#allocation98_spill] sm:$0xff] %v3453_v30 }
 0x17c   : > { %v3457_v23 = vpop.permute.xlu0 %859 }
 0x17d   : > { %4604 = vst [vmem:[#allocation99_spill] sm:$0xff] %v3457_v23  ;;  %1217 = vrot.lane.b32.xlu2 %v2684_v39, %s2476_s6  ;;  %v4613_v23 = vld [vmem:[#allocation30_spill] sm:$0xff] }
 0x17f   : > { %v3461_v11 = vpop.permute.xlu2 %881 }
 0x180   : > { %4605 = vst [vmem:[#allocation100_spill] sm:$0xff] %v3461_v11  ;;  %1121 = vrot.lane.b32.xlu1 %v2629_v13, %s2474_s29 }
 0x182   : > { %v3465_v17 = vpop.permute.xlu1 %861  ;;  %1313 = vrot.lane.b32.xlu0 %v3010_v15, %s2475_s30 }
 0x183   : > { %4606 = vst [vmem:[#allocation101_spill] sm:$0xff] %v3465_v17 }
 0x184   : > { %v3469_v21 = vpop.permute.xlu0 %865 }
 0x185   : > { %1123 = vrot.lane.b32.xlu2 %v2678_v37, %s2474_s29 }
 0x187   : > { %v3473_v28 = vpop.permute.xlu2 %887 }
 0x188   : > { %4607 = vst [vmem:[#allocation102_spill] sm:$0xff] %v3473_v28  ;;  %1027 = vrot.lane.b32.xlu1 %v2996_v34, %s2473_s28 }
 0x18a   : > { %v3477_v39 = vpop.permute.xlu1 %867  ;;  %1219 = vrot.lane.b32.xlu0 %v2714_v54, %s2476_s6 }
 0x18c   : > { %v3481_v13 = vpop.permute.xlu0 %871 }
 0x18d   : > { %1029 = vrot.lane.b32.xlu2 %v3010_v15, %s2473_s28 }
 0x18f   : > { %v3485_v17 = vpop.permute.xlu2 %893 }
 0x190   : > { %4608 = vst [vmem:[#allocation103_spill] sm:$0xff] %v3485_v17  ;;  %1315 = vrot.lane.b32.xlu1 %v3004_v63, %s2475_s30 }
 0x192   : > { %v3489_v37 = vpop.permute.xlu1 %873  ;;  %1125 = vrot.lane.b32.xlu0 %v2686_v40, %s2474_s29 }
 0x194   : > { %v3493_v34 = vpop.permute.xlu0 %877 }
 0x195   : > { %4609 = vst [vmem:[#allocation104_spill] sm:$0xff] %v3493_v34  ;;  %1317 = vrot.lane.b32.xlu2 %v3017_v19, %s2475_s30 }
 0x197   : > { %v3497_v54 = vpop.permute.xlu2 %931 }
 0x198   : > { %1221 = vrot.lane.b32.xlu1 %v2738_v62, %s2476_s6 }
 0x19a   : > { %v3501_v15 = vpop.permute.xlu1 %879  ;;  %1031 = vrot.lane.b32.xlu0 %v3004_v63, %s2473_s28 }
 0x19b   : > { %4610 = vst [vmem:[#allocation105_spill] sm:$0xff] %v3501_v15  ;;  %v4620_v15 = vld [vmem:[#allocation32_spill] sm:$0xff] }
 0x19c   : > { %v3505_v17 = vpop.permute.xlu0 %883 }
 0x19d   : > { %4611 = vst [vmem:[#allocation106_spill] sm:$0xff] %v3505_v17  ;;  %1223 = vrot.lane.b32.xlu2 %v4579_v50, %s2476_s6 }
 0x19f   : > { %v3509_v40 = vpop.permute.xlu2 %937 }
 0x1a0   : > { %1127 = vrot.lane.b32.xlu1 %v2692_v44, %s2474_s29 }
 0x1a2   : > { %v3513_v28 = vpop.permute.xlu1 %885  ;;  %1319 = vrot.lane.b32.xlu0 %v4613_v23, %s2475_s30 }
 0x1a3   : > { %4612 = vst [vmem:[#allocation107_spill] sm:$0xff] %v3513_v28 }
 0x1a4   : > { %v3517_v62 = vpop.permute.xlu0 %889 }
 0x1a5   : > { %4614 = vst [vmem:[#allocation30_spill] sm:$0xff] %v3517_v62  ;;  %1055 = vrot.lane.b32.xlu2 %v3098_v47, %s2473_s28 }
 0x1a7   : > { %v3521_v63 = vpop.permute.xlu2 %943 }
 0x1a8   : > { %1033 = vrot.lane.b32.xlu1 %v3017_v19, %s2473_s28 }
 0x1aa   : > { %v3525_v50 = vpop.permute.xlu1 %891  ;;  %1129 = vrot.lane.b32.xlu0 %v2696_v46, %s2474_s29 }
 0x1ab   : > { %4615 = vst [vmem:[#allocation108_spill] sm:$0xff] %v3525_v50  ;;  %v4618_v50 = vld [vmem:[#allocation29_spill] sm:$0xff] }
 0x1ac   : > { %v3529_v44 = vpop.permute.xlu0 %927 }
 0x1ad   : > { %1225 = vrot.lane.b32.xlu2 %v4583_v57, %s2476_s6 }
 0x1af   : > { %v3533_v28 = vpop.permute.xlu2 %949 }
 0x1b0   : > { %4616 = vst [vmem:[#allocation109_spill] sm:$0xff] %v3533_v28  ;;  %1151 = vrot.lane.b32.xlu1 %v2837_v6, %s2474_s29 }
 0x1b2   : > { %v3537_v62 = vpop.permute.xlu1 %929  ;;  %1247 = vrot.lane.b32.xlu0 %v4597_v22, %s2476_s6 }
 0x1b4   : > { %v3541_v19 = vpop.permute.xlu0 %933 }
 0x1b5   : > { %1343 = vrot.lane.b32.xlu2 %v3132_v26, %s2475_s30 }
 0x1b7   : > { %v3545_v46 = vpop.permute.xlu2 %955 }
 0x1b8   : > { %4617 = vst [vmem:[#allocation110_spill] sm:$0xff] %v3545_v46  ;;  %1321 = vrot.lane.b32.xlu1 %v4618_v50, %s2475_s30  ;;  %v1674_v46 = vld [vmem:[%s4396_s1 + $0x20] sm:$0xf] }
 0x1b9   : > { %2319 = vmatpush.msk.msra.mxu0 %vm1772_vm5, %v1674_v46  ;;  %2391 = vmatpush.msk.msra.mxu2 %vm1772_vm5, %v1674_v46  ;;  %v1671_v46 = vld [vmem:[%s4396_s1 + $0x8] sm:$0xff] }
 0x1ba   : > { %v3549_v57 = vpop.permute.xlu1 %935  ;;  %1035 = vrot.lane.b32.xlu0 %v4613_v23, %s2473_s28 }
 0x1bc   : > { %v3553_v6 = vpop.permute.xlu0 %939 }
 0x1bd   : > { %1131 = vrot.lane.b32.xlu2 %v2744_v4, %s2474_s29  ;;  %v1673_v4 = vld [vmem:[%s4396_s1 + $0x18] sm:$0xff] }
 0x1be   : > { %1788 = vmatpush.msra.mxu0 %v1673_v4  ;;  %2392 = vmatpush.msra.mxu2 %v1673_v4  ;;  %v1670_v4 = vld [vmem:[%s4396_s1] sm:$0xff] }
 0x1bf   : > { %v3557_v22 = vpop.permute.xlu2 %961 }
 0x1c0   : > { %1057 = vrot.lane.b32.xlu1 %v3113_v60, %s2473_s28 }
 0x1c2   : > { %v3561_v17 = vpop.permute.xlu1 %941  ;;  %1153 = vrot.lane.b32.xlu0 %v2839_v7, %s2474_s29  ;;  %v1672_v7 = vld [vmem:[%s4396_s1 + $0x10] sm:$0xff] }
 0x1c3   : > { %1789 = vmatpush.msra.mxu0 %v1672_v7  ;;  %2393 = vmatpush.msra.mxu2 %v1672_v7 }
 0x1c4   : > { %v3568_v23 = vpop.permute.xlu0 %945 }
 0x1c5   : > { %1249 = vrot.lane.b32.xlu2 %v4599_v33, %s2476_s6  ;;  %1790 = vmatpush.msra.mxu0 %v1671_v46 }
 0x1c6   : > { %2394 = vmatpush.msra.mxu2 %v1671_v46 }
 0x1c7   : > { %v1024_v11 = vpop.permute.xlu2 %1023  ;;  %1791 = vmatpush.msra.mxu0 %v1670_v4 }
 0x1c8   : > { %1227 = vrot.lane.b32.xlu1 %v4581_v12, %s2476_s6  ;;  %2395 = vmatpush.msra.mxu2 %v1670_v4 }
 0x1ca   : > { %v3583_v33 = vpop.permute.xlu1 %947  ;;  %1323 = vrot.lane.b32.xlu0 %v4620_v15, %s2475_s30 }
 0x1cb   : > { %4619 = vst [vmem:[#allocation29_spill] sm:$0xff] %v3583_v33 }
 0x1cc   : > { %v3590_v30 = vpop.permute.xlu0 %951 }
 0x1cd   : > { %4621 = vst [vmem:[#allocation32_spill] sm:$0xff] %v3590_v30  ;;  %1037 = vrot.lane.b32.xlu2 %v4618_v50, %s2473_s28  ;;  %v4625_v30 = vld [vmem:[#allocation33_spill] sm:$0xff] }
 0x1cf   : > { %v1312_v12 = vpop.permute.xlu2 %1311 }
 0x1d0   : > { %1345 = vrot.lane.b32.xlu1 %v3123_v2, %s2475_s30 }
 0x1d2   : > { %v3596_v7 = vpop.permute.xlu1 %953  ;;  %1059 = vrot.lane.b32.xlu0 %v3132_v26, %s2473_s28 }
 0x1d3   : > { %4622 = vst [vmem:[#allocation111_spill] sm:$0xff] %v3596_v7 }
 0x1d4   : > { %v3600_v34 = vpop.permute.xlu0 %957 }
 0x1d5   : > { %4623 = vst [vmem:[#allocation112_spill] sm:$0xff] %v3600_v34  ;;  %1155 = vrot.lane.b32.xlu2 %v2875_v53, %s2474_s29  ;;  %v4624_v34 = vld [vmem:[#allocation18_spill] sm:$0xff]  ;;  %v2426_v53 = vld [vmem:[#allocation2] sm:$0xff] }
 0x1d7   : > { %v1218_v46 = vpop.permute.xlu2 %1217 }
 0x1d8   : > { %1133 = vrot.lane.b32.xlu1 %v2730_v59, %s2474_s29 }
 0x1da   : > { %v3606_v50 = vpop.permute.xlu1 %959  ;;  %1229 = vrot.lane.b32.xlu0 %v4585_v58, %s2476_s6  ;;  %v1407_v58 = vsel %vm238_vm0, %v2426_v53, %v4625_v30 }
 0x1db   : > { %v1440_v28 = vsel %vm1439_vm6, %v1407_v58, %v3225_v42  ;;  %v4627_v58 = vld [vmem:[#allocation17_spill] sm:$0xff] }
 0x1dc   : > { %v3610_v4 = vpop.permute.xlu0 %963  ;;  %v1473_v32 = vsel %vm1472_vm7, %v1440_v28, %v3405_v3 }
 0x1dd   : > { %1325 = vrot.lane.b32.xlu2 %v3055_v24, %s2475_s30  ;;  %v1506_v33 = vsel %vm1505_vm9, %v1473_v32, %v3529_v44  ;;  %v2427_v32 = vld [vmem:[#allocation2 + $0x8] sm:$0xff] }
 0x1df   : > { %v1124_v26 = vpop.permute.xlu2 %1123 }
 0x1e0   : > { %1251 = vrot.lane.b32.xlu1 %v4624_v34, %s2476_s6 }
 0x1e2   : > { %v3616_v7 = vpop.permute.xlu1 %965  ;;  %1347 = vrot.lane.b32.xlu0 %v3139_v45, %s2475_s30 }
 0x1e4   : > { %v1120_v59 = vpop.permute.xlu0 %1119 }
 0x1e5   : > { %1061 = vrot.lane.b32.xlu2 %v3123_v2, %s2473_s28  ;;  %v1539_v2 = vsel %vm1538_vm8, %v1506_v33, %v1024_v11  ;;  %v4626_v11 = vld [vmem:[#allocation39_spill] sm:$0xff] }
 0x1e6   : > { %v1572_v42 = vsel %vm1571_vm10, %v1539_v2, %v1120_v59 }
 0x1e7   : > { %v1030_v60 = vpop.permute.xlu2 %1029 }
 0x1e8   : > { %1039 = vrot.lane.b32.xlu1 %v4620_v15, %s2473_s28  ;;  %v1408_v15 = vsel %vm238_vm0, %v2427_v32, %v4626_v11 }
 0x1e9   : > { %v1441_v44 = vsel %vm1439_vm6, %v1408_v15, %v3269_v1 }
 0x1ea   : > { %v1216_v30 = vpop.permute.xlu1 %1215  ;;  %1135 = vrot.lane.b32.xlu0 %v2754_v8, %s2474_s29  ;;  %v1474_v8 = vsel %vm1472_vm7, %v1441_v44, %v3365_v29  ;;  %v2428_v29 = vld [vmem:[#allocation2 + $0x18] sm:$0xff] }
 0x1eb   : > { %v1605_v3 = vsel %vm1604_vm11, %v1572_v42, %v1216_v30 }
 0x1ec   : > { %v1026_v28 = vpop.permute.xlu0 %1025  ;;  %v1638_v53 = vsel %vm1637_vm12, %v1605_v3, %v1312_v12  ;;  %v1507_v12 = vsel %vm1505_vm9, %v1474_v8, %v3537_v62  ;;  %v4628_v62 = vld [vmem:[#allocation37_spill] sm:$0xff] }
 0x1ed   : > { %2320 = vmatmul.msk.f32.vlgmr.msra.gmra.mxu0 %vm1675_vm13, %v1638_v53  ;;  %1231 = vrot.lane.b32.xlu2 %v4589_v48, %s2476_s6  ;;  %v1540_v59 = vsel %vm1538_vm8, %v1507_v12, %v1026_v28  ;;  %v1409_v3 = vsel %vm238_vm0, %v2428_v29, %v4628_v62  ;;  %v4629_v28 = vld [vmem:[#allocation34_spill] sm:$0xff] }
 0x1ee   : > { %v1442_v53 = vsel %vm1439_vm6, %v1409_v3, %v3277_v27 }
 0x1ef   : > { %v1318_v33 = vpop.permute.xlu2 %1317 }
 0x1f0   : > { %1157 = vrot.lane.b32.xlu1 %v2864_v41, %s2474_s29 }
 0x1f2   : > { %v1122_v48 = vpop.permute.xlu1 %1121  ;;  %1253 = vrot.lane.b32.xlu0 %v4627_v58, %s2476_s6 }
 0x1f3   : > { %v1573_v2 = vsel %vm1571_vm10, %v1540_v59, %v1122_v48  ;;  %v3679_v59 = vld [vmem:[#allocation2 + $0x98] sm:$0xff]  ;;  %v4630_v48 = vld [vmem:[#allocation43_spill] sm:$0xff] }
 0x1f4   : > { %v1314_v42 = vpop.permute.xlu0 %1313  ;;  %v1606_v1 = vsel %vm1604_vm11, %v1573_v2, %v1218_v46  ;;  %v1475_v46 = vsel %vm1472_vm7, %v1442_v53, %v3409_v36 }
 0x1f5   : > { %v1639_v30 = vsel %vm1637_vm12, %v1606_v1, %v1314_v42  ;;  %1349 = vrot.lane.b32.xlu2 %v3157_v25, %s2475_s30  ;;  %v1508_v11 = vsel %vm1505_vm9, %v1475_v46, %v3497_v54 }
 0x1f6   : > { %2321 = vmatmul.msk.f32.gmra.mxu0 %vm1675_vm13, %v1639_v30 }
 0x1f7   : > { %v1224_v41 = vpop.permute.xlu2 %1223 }
 0x1f8   : > { %1327 = vrot.lane.b32.xlu1 %v4629_v28, %s2475_s30 }
 0x1fa   : > { %v1028_v32 = vpop.permute.xlu1 %1027  ;;  %967 = vrot.lane.b32.xlu0 %v4624_v34, %s2472_s27 }
 0x1fb   : > { %v1541_v15 = vsel %vm1538_vm8, %v1508_v11, %v1028_v32  ;;  %v4633_v11 = vld [vmem:[#allocation36_spill] sm:$0xff] }
 0x1fc   : > { %v1220_v44 = vpop.permute.xlu0 %1219  ;;  %v1574_v8 = vsel %vm1571_vm10, %v1541_v15, %v1124_v26 }
 0x1fd   : > { %1063 = vrot.lane.b32.xlu2 %v3139_v45, %s2473_s28  ;;  %v1607_v27 = vsel %vm1604_vm11, %v1574_v8, %v1220_v44  ;;  %v2430_v45 = vld [vmem:[#allocation2 + $0x20] sm:$0xff] }
 0x1fe   : > { %v1410_v26 = vsel %vm238_vm0, %v2430_v45, %v4630_v48  ;;  %v2434_v48 = vld [vmem:[#allocation2 + $0x38] sm:$0xff] }
 0x1ff   : > { %v1056_v12 = vpop.permute.xlu2 %1055 }
 0x200   : > { %1041 = vrot.lane.b32.xlu1 %v3055_v24, %s2473_s28  ;;  %v1443_v24 = vsel %vm1439_vm6, %v1410_v26, %v3237_v51  ;;  %v4634_v26 = vld [vmem:[#allocation28_spill] sm:$0xff] }
 0x201   : > { %v1476_v2 = vsel %vm1472_vm7, %v1443_v24, %v3417_v20 }
 0x202   : > { %v1316_v36 = vpop.permute.xlu1 %1315  ;;  %1137 = vrot.lane.b32.xlu0 %v3679_v59, %s2474_s29  ;;  %v1509_v1 = vsel %vm1505_vm9, %v1476_v2, %v3541_v19  ;;  %v2431_v19 = vld [vmem:[#allocation2 + $0x30] sm:$0xff] }
 0x203   : > { %v1640_v34 = vsel %vm1637_vm12, %v1607_v27, %v1316_v36  ;;  %v1542_v30 = vsel %vm1538_vm8, %v1509_v1, %v1030_v60 }
 0x204   : > { %2322 = vmatmul.msk.f32.gmra.mxu0 %vm1675_vm13, %v1640_v34  ;;  %v1126_v54 = vpop.permute.xlu0 %1125  ;;  %v3729_v34 = vld [vmem:[#allocation2 + $0xa8] sm:$0xff] }
 0x205   : > { %1233 = vrot.lane.b32.xlu2 %v4587_v9, %s2476_s6  ;;  %v1575_v29 = vsel %vm1571_vm10, %v1542_v30, %v1126_v54  ;;  %v4631_v9 = vld [vmem:[#allocation19_spill] sm:$0xff] }
 0x207   : > { %v3693_v42 = vpop.permute.xlu2 %1225 }
 0x208   : > { %1159 = vrot.lane.b32.xlu1 %v2882_v0, %s2474_s29  ;;  %v4632_v0 = vld [vmem:[#allocation27_spill] sm:$0xff] }
 0x209   : > { %v1411_v60 = vsel %vm238_vm0, %v2431_v19, %v4632_v0 }
 0x20a   : > { %v1222_v62 = vpop.permute.xlu1 %1221  ;;  %1255 = vrot.lane.b32.xlu0 %v4631_v9, %s2476_s6  ;;  %v1444_v53 = vsel %vm1439_vm6, %v1411_v60, %v3281_v43 }
 0x20b   : > { %v1608_v51 = vsel %vm1604_vm11, %v1575_v29, %v1222_v62  ;;  %v1477_v32 = vsel %vm1472_vm7, %v1444_v53, %v3377_v31  ;;  %v4636_v62 = vld [vmem:[#allocation54_spill] sm:$0xff] }
 0x20c   : > { %v1032_v3 = vpop.permute.xlu0 %1031  ;;  %v1641_v20 = vsel %vm1637_vm12, %v1608_v51, %v1318_v33  ;;  %v1510_v33 = vsel %vm1505_vm9, %v1477_v32, %v3549_v57 }
 0x20d   : > { %2323 = vmatmul.msk.f32.gmra.mxu0 %vm1675_vm13, %v1641_v20  ;;  %1351 = vrot.lane.b32.xlu2 %v3149_v38, %s2475_s30  ;;  %v1543_v15 = vsel %vm1538_vm8, %v1510_v33, %v1032_v3  ;;  %v4637_v3 = vld [vmem:[#allocation40_spill] sm:$0xff] }
 0x20f   : > { %v1344_v46 = vpop.permute.xlu2 %1343 }
 0x210   : > { %1329 = vrot.lane.b32.xlu1 %v4633_v11, %s2475_s30 }
 0x212   : > { %v1128_v44 = vpop.permute.xlu1 %1127  ;;  %969 = vrot.lane.b32.xlu0 %v4627_v58, %s2472_s27 }
 0x213   : > { %v1576_v8 = vsel %vm1571_vm10, %v1543_v15, %v1128_v44 }
 0x214   : > { %v1320_v27 = vpop.permute.xlu0 %1319  ;;  %v1609_v43 = vsel %vm1604_vm11, %v1576_v8, %v1224_v41  ;;  %v3735_v41 = vld [vmem:[#allocation2 + $0xc0] sm:$0xff] }
 0x215   : > { %v1642_v36 = vsel %vm1637_vm12, %v1609_v43, %v1320_v27  ;;  %1065 = vrot.lane.b32.xlu2 %v3157_v25, %s2473_s28  ;;  %v1423_v25 = vsel %vm238_vm0, %v3735_v41, %v3195_v61  ;;  %v4635_v61 = vld [vmem:[#allocation21_spill] sm:$0xff]  ;;  %v3800_v27 = vld [vmem:[#allocation2 + $0x138] sm:$0xff]  ;;  %v3804_v43 = vld [vmem:[#allocation2 + $0xc8] sm:$0xff] }
 0x216   : > { %2324 = vmatmul.msk.f32.gmra.mxu0 %vm1675_vm13, %v1642_v36 }
 0x217   : > { %v1132_v31 = vpop.permute.xlu2 %1131 }
 0x218   : > { %1043 = vrot.lane.b32.xlu1 %v4629_v28, %s2473_s28  ;;  %v1456_v28 = vsel %vm1439_vm6, %v1423_v25, %v3333_v56 }
 0x219   : > { %v1489_v45 = vsel %vm1472_vm7, %v1456_v28, %v3425_v35 }
 0x21a   : > { %v1034_v57 = vpop.permute.xlu1 %1033  ;;  %1139 = vrot.lane.b32.xlu0 %v3729_v34, %s2474_s29  ;;  %v1522_v24 = vsel %vm1505_vm9, %v1489_v45, %v3606_v50 }
 0x21b   : > { %v1555_v1 = vsel %vm1538_vm8, %v1522_v24, %v1056_v12 }
 0x21c   : > { %v1130_v58 = vpop.permute.xlu0 %1129 }
 0x21d   : > { %1235 = vrot.lane.b32.xlu2 %v4590_v55, %s2476_s6  ;;  %v1412_v55 = vsel %vm238_vm0, %v2434_v48, %v4634_v26 }
 0x21e   : > { %v1445_v56 = vsel %vm1439_vm6, %v1412_v55, %v3293_v16  ;;  %v4642_v55 = vld [vmem:[#allocation58_spill] sm:$0xff] }
 0x21f   : > { %v3740_v54 = vpop.permute.xlu2 %1249 }
 0x220   : > { %1161 = vrot.lane.b32.xlu1 %v2884_v14, %s2474_s29  ;;  %v1478_v14 = vsel %vm1472_vm7, %v1445_v56, %v3421_v49 }
 0x221   : > { %v1511_v29 = vsel %vm1505_vm9, %v1478_v14, %v3509_v40  ;;  %v1892_v14 = vld [vmem:[%s4397_s2 + $0x18] sm:$0xff] }
 0x222   : > { %v1152_v2 = vpop.permute.xlu1 %1151  ;;  %1257 = vrot.lane.b32.xlu0 %v4635_v61, %s2476_s6  ;;  %v1544_v51 = vsel %vm1538_vm8, %v1511_v29, %v1034_v57  ;;  %v4641_v57 = vld [vmem:[#allocation88_spill] sm:$0xff]  ;;  %2005 = vmatpush.msra.mxu1 %v1892_v14 }
 0x223   : > { %v1588_v35 = vsel %vm1571_vm10, %v1555_v1, %v1152_v2  ;;  %v1577_v12 = vsel %vm1571_vm10, %v1544_v51, %v1130_v58  ;;  %2396 = vmatpush.msra.mxu3 %v1892_v14  ;;  %v4644_v29 = vld [vmem:[#allocation48_spill] sm:$0xff]  ;;  %v2443_v14 = vld [vmem:[#allocation2 + $0x60] sm:$0xff] }
 0x224   : > { %v1248_v30 = vpop.permute.xlu0 %1247  ;;  %v1610_v40 = vsel %vm1604_vm11, %v1577_v12, %v3693_v42  ;;  %v2436_v42 = vld [vmem:[#allocation2 + $0x48] sm:$0xff]  ;;  %v1889_v12 = vld [vmem:[%s4397_s2] sm:$0xff] }
 0x225   : > { %v1621_v50 = vsel %vm1604_vm11, %v1588_v35, %v1248_v30  ;;  %1353 = vrot.lane.b32.xlu2 %v4636_v62, %s2475_s30  ;;  %v2439_v30 = vld [vmem:[#allocation2 + $0x50] sm:$0xff] }
 0x226   : > { %v1654_v16 = vsel %vm1637_vm12, %v1621_v50, %v1344_v46  ;;  %v3785_v46 = vld [vmem:[#allocation2 + $0xb0] sm:$0xff]  ;;  %v1414_v50 = vsel %vm238_vm0, %v2439_v30, %v4644_v29  ;;  %v4656_v30 = vld [vmem:[#allocation80_spill] sm:$0xff] }
 0x227   : > { %2336 = vmatmul.msk.f32.vlgmr.msra.gmra.mxu2 %vm1675_vm13, %v1654_v16  ;;  %v3769_v49 = vpop.permute.xlu2 %1037  ;;  %v4645_v16 = vld [vmem:[#allocation78_spill] sm:$0xff] }
 0x228   : > { %1331 = vrot.lane.b32.xlu1 %v4637_v3, %s2475_s30 }
 0x22a   : > { %v1322_v20 = vpop.permute.xlu1 %1321  ;;  %971 = vrot.lane.b32.xlu0 %v4631_v9, %s2472_s27  ;;  %v4638_v9 = vld [vmem:[#allocation44_spill] sm:$0xff] }
 0x22b   : > { %v1643_v19 = vsel %vm1637_vm12, %v1610_v40, %v1322_v20  ;;  %v1413_v32 = vsel %vm238_vm0, %v2436_v42, %v4638_v9  ;;  %v4646_v20 = vld [vmem:[#allocation6_spill] sm:$0xff] }
 0x22c   : > { %2325 = vmatmul.msk.f32.gmra.mxu0 %vm1675_vm13, %v1643_v19  ;;  %v1036_v0 = vpop.permute.xlu0 %1035  ;;  %v1446_v15 = vsel %vm1439_vm6, %v1413_v32, %v3249_v52  ;;  %v4639_v52 = vld [vmem:[#allocation46_spill] sm:$0xff] }
 0x22d   : > { %1067 = vrot.lane.b32.xlu2 %v3149_v38, %s2473_s28  ;;  %v1479_v38 = vsel %vm1472_vm7, %v1446_v15, %v3429_v5  ;;  %v4640_v5 = vld [vmem:[#allocation20_spill] sm:$0xff]  ;;  %v4647_v42 = vld [vmem:[#allocation62_spill] sm:$0xff]  ;;  %v4648_v15 = vld [vmem:[#allocation79_spill] sm:$0xff] }
 0x22f   : > { %v3781_v60 = vpop.permute.xlu2 %1155 }
 0x230   : > { %1045 = vrot.lane.b32.xlu1 %v4633_v11, %s2473_s28  ;;  %v1512_v11 = vsel %vm1505_vm9, %v1479_v38, %v3553_v6 }
 0x231   : > { %v1545_v8 = vsel %vm1538_vm8, %v1512_v11, %v1036_v0 }
 0x232   : > { %v1058_v53 = vpop.permute.xlu1 %1057  ;;  %1141 = vrot.lane.b32.xlu0 %v3785_v46, %s2474_s29  ;;  %v1578_v58 = vsel %vm1571_vm10, %v1545_v8, %v1132_v31 }
 0x234   : > { %v1154_v33 = vpop.permute.xlu0 %1153 }
 0x235   : > { %1237 = vrot.lane.b32.xlu2 %v4593_v10, %s2476_s6  ;;  %v1424_v10 = vsel %vm238_vm0, %v3804_v43, %v4639_v52 }
 0x236   : > { %v1457_v6 = vsel %vm1439_vm6, %v1424_v10, %v4641_v57 }
 0x237   : > { %v1326_v44 = vpop.permute.xlu2 %1325  ;;  %v1490_v25 = vsel %vm1472_vm7, %v1457_v6, %v3469_v21  ;;  %v4643_v21 = vld [vmem:[#allocation38_spill] sm:$0xff] }
 0x238   : > { %1163 = vrot.lane.b32.xlu1 %v3800_v27, %s2474_s29  ;;  %v1523_v48 = vsel %vm1505_vm9, %v1490_v25, %v3557_v22  ;;  %v4650_v6 = vld [vmem:[#allocation22_spill] sm:$0xff]  ;;  %v4651_v25 = vld [vmem:[#allocation56_spill] sm:$0xff] }
 0x239   : > { %v1556_v24 = vsel %vm1538_vm8, %v1523_v48, %v1058_v53  ;;  %v3865_v53 = vld [vmem:[#allocation2 + $0xd8] sm:$0xff] }
 0x23a   : > { %v1228_v36 = vpop.permute.xlu1 %1227  ;;  %1259 = vrot.lane.b32.xlu0 %v4640_v5, %s2476_s6  ;;  %v1589_v31 = vsel %vm1571_vm10, %v1556_v24, %v1154_v33  ;;  %v1425_v9 = vsel %vm238_vm0, %v3865_v53, %v4647_v42  ;;  %v4653_v24 = vld [vmem:[#allocation66_spill] sm:$0xff]  ;;  %v4659_v42 = vld [vmem:[#allocation24_spill] sm:$0xff] }
 0x23b   : > { %v1611_v28 = vsel %vm1604_vm11, %v1578_v58, %v1228_v36  ;;  %v1622_v22 = vsel %vm1604_vm11, %v1589_v31, %v3740_v54  ;;  %v1890_v54 = vld [vmem:[%s4397_s2 + $0x8] sm:$0xff] }
 0x23c   : > { %v1324_v45 = vpop.permute.xlu0 %1323  ;;  %v3883_v36 = vld [vmem:[#allocation2 + $0x140] sm:$0xff] }
 0x23d   : > { %v1644_v26 = vsel %vm1637_vm12, %v1611_v28, %v1324_v45  ;;  %1355 = vrot.lane.b32.xlu2 %v4642_v55, %s2475_s30  ;;  %v4652_v45 = vld [vmem:[#allocation42_spill] sm:$0xff] }
 0x23e   : > { %2326 = vmatmul.msk.f32.gmra.mxu0 %vm1675_vm13, %v1644_v26 }
 0x23f   : > { %v3825_v2 = vpop.permute.xlu2 %1061 }
 0x240   : > { %1333 = vrot.lane.b32.xlu1 %v4643_v21, %s2475_s30 }
 0x242   : > { %v1346_v56 = vpop.permute.xlu1 %1345  ;;  %973 = vrot.lane.b32.xlu0 %v4635_v61, %s2472_s27  ;;  %v1891_v61 = vld [vmem:[%s4397_s2 + $0x10] sm:$0xff] }
 0x243   : > { %v1655_v1 = vsel %vm1637_vm12, %v1622_v22, %v1346_v56  ;;  %2006 = vmatpush.msra.mxu1 %v1891_v61  ;;  %2397 = vmatpush.msra.mxu3 %v1891_v61  ;;  %v4654_v22 = vld [vmem:[#allocation90_spill] sm:$0xff] }
 0x244   : > { %2337 = vmatmul.msk.f32.gmra.mxu2 %vm1675_vm13, %v1655_v1  ;;  %v1060_v35 = vpop.permute.xlu0 %1059 }
 0x245   : > { %1069 = vrot.lane.b32.xlu2 %v4636_v62, %s2473_s28  ;;  %v1447_v62 = vsel %vm1439_vm6, %v1414_v50, %v4645_v16  ;;  %2007 = vmatpush.msra.mxu1 %v1890_v54  ;;  %v4657_v50 = vld [vmem:[#allocation8_spill] sm:$0xff] }
 0x246   : > { %v1480_v40 = vsel %vm1472_vm7, %v1447_v62, %v4646_v20  ;;  %2398 = vmatpush.msra.mxu3 %v1890_v54  ;;  %v4658_v20 = vld [vmem:[#allocation11_spill] sm:$0xff] }
 0x247   : > { %v3848_v51 = vpop.permute.xlu2 %1231  ;;  %v1513_v19 = vsel %vm1505_vm9, %v1480_v40, %v3561_v17  ;;  %2008 = vmatpush.msra.mxu1 %v1889_v12  ;;  %v1458_v17 = vsel %vm1439_vm6, %v1425_v9, %v4648_v15  ;;  %v4660_v15 = vld [vmem:[#allocation60_spill] sm:$0xff] }
 0x248   : > { %1047 = vrot.lane.b32.xlu1 %v4637_v3, %s2473_s28  ;;  %v1546_v3 = vsel %vm1538_vm8, %v1513_v19, %v3769_v49  ;;  %2399 = vmatpush.msra.mxu3 %v1889_v12  ;;  %v1491_v49 = vsel %vm1472_vm7, %v1458_v17, %v3477_v39 }
 0x249   : > { %v1524_v8 = vsel %vm1505_vm9, %v1491_v49, %v3610_v4 }
 0x24a   : > { %v1134_v0 = vpop.permute.xlu1 %1133  ;;  %1143 = vrot.lane.b32.xlu0 %v3735_v41, %s2474_s29  ;;  %v4649_v41 = vld [vmem:[#allocation12_spill] sm:$0xff]  ;;  %v1557_v10 = vsel %vm1538_vm8, %v1524_v8, %v1060_v35  ;;  %v4655_v35 = vld [vmem:[#allocation31_spill] sm:$0xff]  ;;  %v4662_v8 = vld [vmem:[#allocation50_spill] sm:$0xff] }
 0x24b   : > { %v1579_v32 = vsel %vm1571_vm10, %v1546_v3, %v1134_v0  ;;  %v1590_v39 = vsel %vm1571_vm10, %v1557_v10, %v3781_v60  ;;  %v3902_v60 = vld [vmem:[#allocation2 + $0xe0] sm:$0xff]  ;;  %v3937_v0 = vld [vmem:[#allocation2 + $0x150] sm:$0xff] }
 0x24c   : > { %v1230_v33 = vpop.permute.xlu0 %1229  ;;  %v1426_v31 = vsel %vm238_vm0, %v3902_v60, %v4653_v24  ;;  %v4663_v10 = vld [vmem:[#allocation93_spill] sm:$0xff] }
 0x24d   : > { %v1612_v38 = vsel %vm1604_vm11, %v1579_v32, %v1230_v33  ;;  %1239 = vrot.lane.b32.xlu2 %v4649_v41, %s2476_s6  ;;  %v1459_v1 = vsel %vm1439_vm6, %v1426_v31, %v4654_v22  ;;  %v4666_v31 = vld [vmem:[#allocation10_spill] sm:$0xff] }
 0x24e   : > { %v1645_v11 = vsel %vm1637_vm12, %v1612_v38, %v1326_v44  ;;  %v4661_v38 = vld [vmem:[#allocation45_spill] sm:$0xff] }
 0x24f   : > { %2327 = vmatmul.msk.f32.gmra.mxu0 %vm1675_vm13, %v1645_v11  ;;  %v1350_v52 = vpop.permute.xlu2 %1349  ;;  %v2445_v11 = vld [vmem:[#allocation2 + $0xf0] sm:$0xff] }
 0x250   : > { %1165 = vrot.lane.b32.xlu1 %v3883_v36, %s2474_s29 }
 0x252   : > { %v1252_v57 = vpop.permute.xlu1 %1251  ;;  %1261 = vrot.lane.b32.xlu0 %v4650_v6, %s2476_s6 }
 0x253   : > { %v1623_v44 = vsel %vm1604_vm11, %v1590_v39, %v1252_v57 }
 0x254   : > { %v1348_v4 = vpop.permute.xlu0 %1347 }
 0x255   : > { %v1656_v58 = vsel %vm1637_vm12, %v1623_v44, %v1348_v4  ;;  %1357 = vrot.lane.b32.xlu2 %v4651_v25, %s2475_s30  ;;  %v2446_v4 = vld [vmem:[#allocation2 + $0x68] sm:$0xff] }
 0x256   : > { %2338 = vmatmul.msk.f32.gmra.mxu2 %vm1675_vm13, %v1656_v58  ;;  %v4664_v58 = vld [vmem:[#allocation49_spill] sm:$0xff] }
 0x257   : > { %v1064_v28 = vpop.permute.xlu2 %1063 }
 0x258   : > { %1335 = vrot.lane.b32.xlu1 %v4652_v45, %s2475_s30 }
 0x25a   : > { %v1040_v48 = vpop.permute.xlu1 %1039  ;;  %975 = vrot.lane.b32.xlu0 %v4640_v5, %s2472_s27  ;;  %v1492_v5 = vsel %vm1472_vm7, %v1459_v1, %v3437_v18 }
 0x25b   : > { %v1525_v61 = vsel %vm1505_vm9, %v1492_v5, %v3616_v7 }
 0x25c   : > { %v1136_v26 = vpop.permute.xlu0 %1135 }
 0x25d   : > { %1071 = vrot.lane.b32.xlu2 %v4642_v55, %s2473_s28  ;;  %v1415_v55 = vsel %vm238_vm0, %v2443_v14, %v4655_v35  ;;  %v4667_v35 = vld [vmem:[#allocation13_spill] sm:$0xff] }
 0x25e   : > { %v1448_v29 = vsel %vm1439_vm6, %v1415_v55, %v4656_v30 }
 0x25f   : > { %v3907_v56 = vpop.permute.xlu2 %1233  ;;  %v1481_v18 = vsel %vm1472_vm7, %v1448_v29, %v4657_v50  ;;  %v4668_v29 = vld [vmem:[#allocation23_spill] sm:$0xff] }
 0x260   : > { %1049 = vrot.lane.b32.xlu1 %v4643_v21, %s2473_s28  ;;  %v1558_v21 = vsel %vm1538_vm8, %v1525_v61, %v3825_v2  ;;  %v1514_v12 = vsel %vm1505_vm9, %v1481_v18, %v3521_v63 }
 0x262   : > { %v1158_v54 = vpop.permute.xlu1 %1157  ;;  %1145 = vrot.lane.b32.xlu0 %v3804_v43, %s2474_s29  ;;  %v1547_v43 = vsel %vm1538_vm8, %v1514_v12, %v1040_v48  ;;  %v1416_v48 = vsel %vm238_vm0, %v2446_v4, %v4664_v58  ;;  %v4043_v58 = vld [vmem:[#allocation2 + $0x168] sm:$0xff] }
 0x263   : > { %v1591_v16 = vsel %vm1571_vm10, %v1558_v21, %v1158_v54  ;;  %v1580_v2 = vsel %vm1571_vm10, %v1547_v43, %v1136_v26  ;;  %v3989_v54 = vld [vmem:[#allocation2 + $0x158] sm:$0xff]  ;;  %v4670_v43 = vld [vmem:[#allocation67_spill] sm:$0xff] }
 0x264   : > { %v1254_v62 = vpop.permute.xlu0 %1253  ;;  %v1613_v9 = vsel %vm1604_vm11, %v1580_v2, %v3848_v51  ;;  %v4671_v2 = vld [vmem:[#allocation82_spill] sm:$0xff] }
 0x265   : > { %v1624_v7 = vsel %vm1604_vm11, %v1591_v16, %v1254_v62  ;;  %1241 = vrot.lane.b32.xlu2 %v4658_v20, %s2476_s6  ;;  %v4669_v16 = vld [vmem:[#allocation63_spill] sm:$0xff]  ;;  %v2448_v20 = vld [vmem:[#allocation2 + $0xf8] sm:$0xff] }
 0x266   : > { %v1657_v40 = vsel %vm1637_vm12, %v1624_v7, %v1350_v52  ;;  %v1427_v52 = vsel %vm238_vm0, %v2445_v11, %v4662_v8 }
 0x267   : > { %2339 = vmatmul.msk.f32.gmra.mxu2 %vm1675_vm13, %v1657_v40  ;;  %v1352_v19 = vpop.permute.xlu2 %1351  ;;  %v1460_v57 = vsel %vm1439_vm6, %v1427_v52, %v4663_v10  ;;  %v1428_v40 = vsel %vm238_vm0, %v2448_v20, %v4670_v43  ;;  %v4675_v52 = vld [vmem:[#allocation29_spill] sm:$0xff]  ;;  %v4685_v20 = vld [vmem:[#allocation83_spill] sm:$0xff] }
 0x268   : > { %1167 = vrot.lane.b32.xlu1 %v3937_v0, %s2474_s29  ;;  %v1493_v39 = vsel %vm1472_vm7, %v1460_v57, %v3481_v13  ;;  %v4676_v57 = vld [vmem:[#allocation15_spill] sm:$0xff] }
 0x26a   : > { %v1793_v63 = vpop.f32.mrf.mxu0  ;;  %v1328_v3 = vpop.permute.xlu1 %1327  ;;  %1263 = vrot.lane.b32.xlu0 %v4659_v42, %s2476_s6 }
 0x26b   : > { %2352 = vmatmul.msk.f32.vlgmr.msra.gmra.mxu1 %vm1637_vm12, %v1793_v63  ;;  %v1646_v32 = vsel %vm1637_vm12, %v1613_v9, %v1328_v3  ;;  %v4672_v9 = vld [vmem:[#allocation51_spill] sm:$0xff] }
 0x26c   : > { %2328 = vmatmul.msk.f32.gmra.mxu0 %vm1675_vm13, %v1646_v32  ;;  %v968_v33 = vpop.permute.xlu0 %967 }
 0x26d   : > { %1359 = vrot.lane.b32.xlu2 %v4660_v15, %s2475_s30 }
 0x26f   : > { %v3950_v17 = vpop.permute.xlu2 %1065 }
 0x270   : > { %1337 = vrot.lane.b32.xlu1 %v4661_v38, %s2475_s30 }
 0x272   : > { %v1042_v41 = vpop.permute.xlu1 %1041  ;;  %977 = vrot.lane.b32.xlu0 %v4650_v6, %s2472_s27  ;;  %v1526_v6 = vsel %vm1505_vm9, %v1493_v39, %v968_v33 }
 0x273   : > { %v1796_v51 = vpop.f32.mrf.mxu0  ;;  %v1559_v13 = vsel %vm1538_vm8, %v1526_v6, %v1064_v28 }
 0x274   : > { %v1138_v49 = vpop.permute.xlu0 %1137  ;;  %2353 = vmatmul.msk.f32.gmra.mxu1 %vm1637_vm12, %v1796_v51 }
 0x275   : > { %1073 = vrot.lane.b32.xlu2 %v4651_v25, %s2473_s28  ;;  %v4665_v25 = vld [vmem:[#allocation74_spill] sm:$0xff] }
 0x276   : > { %v1449_v24 = vsel %vm1439_vm6, %v1416_v48, %v4665_v25 }
 0x277   : > { %v3965_v44 = vpop.permute.xlu2 %1235  ;;  %v1482_v22 = vsel %vm1472_vm7, %v1449_v24, %v4666_v31  ;;  %v4678_v31 = vld [vmem:[#allocation61_spill] sm:$0xff] }
 0x278   : > { %1051 = vrot.lane.b32.xlu1 %v4652_v45, %s2473_s28  ;;  %v1515_v45 = vsel %vm1505_vm9, %v1482_v22, %v3568_v23 }
 0x27a   : > { %v1160_v26 = vpop.permute.xlu1 %1159  ;;  %1147 = vrot.lane.b32.xlu0 %v3865_v53, %s2474_s29  ;;  %v1548_v53 = vsel %vm1538_vm8, %v1515_v45, %v1042_v41 }
 0x27b   : > { %v1592_v1 = vsel %vm1571_vm10, %v1559_v13, %v1160_v26  ;;  %v1581_v28 = vsel %vm1571_vm10, %v1548_v53, %v1138_v49  ;;  %v4674_v49 = vld [vmem:[#allocation9_spill] sm:$0xff]  ;;  %v4063_v53 = vld [vmem:[#allocation2 + $0x170] sm:$0xff] }
 0x27c   : > { %v1256_v5 = vpop.permute.xlu0 %1255  ;;  %v1614_v21 = vsel %vm1604_vm11, %v1581_v28, %v3907_v56  ;;  %v4677_v26 = vld [vmem:[#allocation25_spill] sm:$0xff] }
 0x27d   : > { %v1625_v14 = vsel %vm1604_vm11, %v1592_v1, %v1256_v5  ;;  %1243 = vrot.lane.b32.xlu2 %v4667_v35, %s2476_s6  ;;  %v4679_v1 = vld [vmem:[#allocation47_spill] sm:$0xff] }
 0x27e   : > { %v1658_v55 = vsel %vm1637_vm12, %v1625_v14, %v1352_v19  ;;  %v1461_v19 = vsel %vm1439_vm6, %v1428_v40, %v4671_v2  ;;  %v2451_v14 = vld [vmem:[#allocation2 + $0x108] sm:$0xff] }
 0x27f   : > { %2340 = vmatmul.msk.f32.gmra.mxu2 %vm1675_vm13, %v1658_v55  ;;  %v1354_v61 = vpop.permute.xlu2 %1353  ;;  %v4681_v55 = vld [vmem:[#allocation94_spill] sm:$0xff] }
 0x280   : > { %1169 = vrot.lane.b32.xlu1 %v3989_v54, %s2474_s29  ;;  %v4686_v2 = vld [vmem:[#allocation14_spill] sm:$0xff] }
 0x281   : > { %v1799_v23 = vpop.f32.mrf.mxu0 }
 0x282   : > { %2354 = vmatmul.msk.f32.gmra.mxu1 %vm1637_vm12, %v1799_v23  ;;  %v1330_v30 = vpop.permute.xlu1 %1329  ;;  %1265 = vrot.lane.b32.xlu0 %v4668_v29, %s2476_s6 }
 0x283   : > { %v1647_v50 = vsel %vm1637_vm12, %v1614_v21, %v1330_v30 }
 0x284   : > { %2329 = vmatmul.msk.f32.gmra.mxu0 %vm1675_vm13, %v1647_v50  ;;  %v970_v18 = vpop.permute.xlu0 %969  ;;  %v2453_v50 = vld [vmem:[#allocation2 + $0x80] sm:$0xff] }
 0x285   : > { %1361 = vrot.lane.b32.xlu2 %v4669_v16, %s2475_s30 }
 0x287   : > { %v4002_v62 = vpop.permute.xlu2 %1067 }
 0x288   : > { %1339 = vrot.lane.b32.xlu1 %v3098_v47, %s2475_s30  ;;  %v1494_v47 = vsel %vm1472_vm7, %v1461_v19, %v3489_v37 }
 0x289   : > { %v1527_v3 = vsel %vm1505_vm9, %v1494_v47, %v970_v18  ;;  %v4683_v18 = vld [vmem:[#allocation35_spill] sm:$0xff] }
 0x28a   : > { %v1802_v12 = vpop.f32.mrf.mxu0  ;;  %v1044_v7 = vpop.permute.xlu1 %1043  ;;  %979 = vrot.lane.b32.xlu0 %v4659_v42, %s2472_s27  ;;  %v2449_v42 = vld [vmem:[#allocation2 + $0x78] sm:$0xff]  ;;  %v1560_v37 = vsel %vm1538_vm8, %v1527_v3, %v3950_v17  ;;  %v4687_v3 = vld [vmem:[#allocation109_spill] sm:$0xff] }
 0x28b   : > { %2355 = vmatmul.msk.f32.gmra.mxu1 %vm1637_vm12, %v1802_v12  ;;  %v1417_v32 = vsel %vm238_vm0, %v2449_v42, %v4672_v9  ;;  %v1418_v12 = vsel %vm238_vm0, %v2453_v50, %v4683_v18 }
 0x28c   : > { %v1140_v56 = vpop.permute.xlu0 %1139  ;;  %v1451_v43 = vsel %vm1439_vm6, %v1418_v12, %v4685_v20 }
 0x28d   : > { %1075 = vrot.lane.b32.xlu2 %v4660_v15, %s2473_s28  ;;  %v4673_v15 = vld [vmem:[#allocation81_spill] sm:$0xff] }
 0x28e   : > { %v1450_v41 = vsel %vm1439_vm6, %v1417_v32, %v4673_v15  ;;  %v4688_v32 = vld [vmem:[#allocation89_spill] sm:$0xff]  ;;  %v4689_v15 = vld [vmem:[#allocation91_spill] sm:$0xff] }
 0x28f   : > { %v4017_v63 = vpop.permute.xlu2 %1237  ;;  %v1483_v11 = vsel %vm1472_vm7, %v1450_v41, %v4674_v49  ;;  %v616_v41 = vrot.slane %v4689_v15, 1 }
 0x290   : > { %1053 = vrot.lane.b32.xlu1 %v4661_v38, %s2473_s28  ;;  %v1516_v10 = vsel %vm1505_vm9, %v1483_v11, %v4675_v52  ;;  %v4690_v11 = vld [vmem:[#allocation65_spill] sm:$0xff] }
 0x291   : > { %v1549_v39 = vsel %vm1538_vm8, %v1516_v10, %v1044_v7  ;;  %v2454_v10 = vld [vmem:[#allocation2 + $0x188] sm:$0xff] }
 0x292   : > { %v1162_v33 = vpop.permute.xlu1 %1161  ;;  %1149 = vrot.lane.b32.xlu0 %v3902_v60, %s2474_s29  ;;  %v1582_v6 = vsel %vm1571_vm10, %v1549_v39, %v1140_v56  ;;  %v4684_v56 = vld [vmem:[#allocation26_spill] sm:$0xff] }
 0x293   : > { %v1805_v51 = vpop.f32.mrf.mxu0  ;;  %v1593_v38 = vsel %vm1571_vm10, %v1560_v37, %v1162_v33  ;;  %v1615_v25 = vsel %vm1604_vm11, %v1582_v6, %v3965_v44  ;;  %v4680_v44 = vld [vmem:[#allocation68_spill] sm:$0xff]  ;;  %v617_v33 = vrot.slane %v4688_v32, 1 }
 0x294   : > { %v1258_v8 = vpop.permute.xlu0 %1257  ;;  %2356 = vmatmul.msk.f32.gmra.mxu1 %vm1637_vm12, %v1805_v51  ;;  %v1429_v35 = vsel %vm238_vm0, %v2451_v14, %v4680_v44  ;;  %v4693_v44 = vld [vmem:[#allocation104_spill] sm:$0xff] }
 0x295   : > { %v1626_v60 = vsel %vm1604_vm11, %v1593_v38, %v1258_v8  ;;  %1245 = vrot.lane.b32.xlu2 %v4676_v57, %s2476_s6  ;;  %v1462_v28 = vsel %vm1439_vm6, %v1429_v35, %v4681_v55  ;;  %v618_v52 = vsel %vm451_vm2, %v616_v41, %v617_v33  ;;  %v2455_v57 = vld [vmem:[#allocation2 + $0x180] sm:$0xff] }
 0x296   : > { %v1659_v17 = vsel %vm1637_vm12, %v1626_v60, %v1354_v61  ;;  %v4682_v61 = vld [vmem:[#allocation16_spill] sm:$0xff]  ;;  %v622_v60 = vrot.slane %v2454_v10, 2  ;;  %v621_v39 = vrot.slane %v2455_v57, 2 }
 0x297   : > { %2341 = vmatmul.msk.f32.gmra.mxu2 %vm1675_vm13, %v1659_v17  ;;  %v1356_v4 = vpop.permute.xlu2 %1355  ;;  %v1495_v23 = vsel %vm1472_vm7, %v1462_v28, %v4682_v61 }
 0x298   : > { %1171 = vrot.lane.b32.xlu1 %v4043_v58, %s2474_s29 }
 0x29a   : > { %v1332_v48 = vpop.permute.xlu1 %1331  ;;  %1267 = vrot.lane.b32.xlu0 %v4677_v26, %s2476_s6 }
 0x29b   : > { %v1648_v24 = vsel %vm1637_vm12, %v1615_v25, %v1332_v48  ;;  %v623_v48 = vsel %vm532_vm4, %v621_v39, %v622_v60  ;;  %v399_v25 = vld [vmem:[#allocation2 + $0x190] sm:$0x3] }
 0x29c   : > { %2330 = vmatmul.msk.f32.gmra.mxu0 %vm1675_vm13, %v1648_v24  ;;  %v972_v13 = vpop.permute.xlu0 %971  ;;  %v624_v14 = vrot.slane %v399_v25, 2 }
 0x29d   : > { %1363 = vrot.lane.b32.xlu2 %v4678_v31, %s2475_s30 }
 0x29e   : > { %v625_v12 = vsel %vm532_vm4, %v622_v60, %v624_v14 }
 0x29f   : > { %v4055_v22 = vpop.permute.xlu2 %1069 }
 0x2a0   : > { %1341 = vrot.lane.b32.xlu1 %v4679_v1, %s2475_s30 }
 0x2a2   : > { %v1046_v5 = vpop.permute.xlu1 %1045  ;;  %981 = vrot.lane.b32.xlu0 %v4668_v29, %s2472_s27  ;;  %v1528_v29 = vsel %vm1505_vm9, %v1495_v23, %v972_v13  ;;  %v2456_v13 = vld [vmem:[#allocation2 + $0x110] sm:$0xff]  ;;  %v619_v23 = vrot.slane %v399_v25, 1 }
 0x2a3   : > { %v1561_v40 = vsel %vm1538_vm8, %v1528_v29, %v4002_v62  ;;  %v2457_v29 = vld [vmem:[#allocation2 + $0x90] sm:$0xff] }
 0x2a4   : > { %v1142_v45 = vpop.permute.xlu0 %1141 }
 0x2a5   : > { %1173 = vrot.lane.b32.xlu2 %v4063_v53, %s2474_s29 }
 0x2a7   : > { %v4071_v30 = vpop.permute.xlu2 %1239 }
 0x2a8   : > { %1077 = vrot.lane.b32.xlu1 %v4669_v16, %s2473_s28  ;;  %v1484_v16 = vsel %vm1472_vm7, %v1451_v43, %v4686_v2 }
 0x2a9   : > { %v1808_v21 = vpop.f32.mrf.mxu0  ;;  %v1517_v42 = vsel %vm1505_vm9, %v1484_v16, %v4687_v3 }
 0x2aa   : > { %2357 = vmatmul.msk.f32.gmra.mxu1 %vm1637_vm12, %v1808_v21  ;;  %v1164_v7 = vpop.permute.xlu1 %1163  ;;  %1269 = vrot.lane.b32.xlu0 %v4684_v56, %s2476_s6  ;;  %v1550_v62 = vsel %vm1538_vm8, %v1517_v42, %v1046_v5  ;;  %v4692_v5 = vld [vmem:[#allocation95_spill] sm:$0xff]  ;;  %v4123_v55 = vpop.f32.mrf.mxu2  ;;  %v4694_v21 = vld [vmem:[#allocation52_spill] sm:$0xff]  ;;  %v620_v42 = vsel %vm451_vm2, %v617_v33, %v619_v23 }
 0x2ab   : > { %v1594_v19 = vsel %vm1571_vm10, %v1561_v40, %v1164_v7  ;;  %v1583_v51 = vsel %vm1571_vm10, %v1550_v62, %v1142_v45  ;;  %v1419_v50 = vsel %vm238_vm0, %v2457_v29, %v4694_v21  ;;  %v4695_v7 = vld [vmem:[#allocation76_spill] sm:$0xff]  ;;  %v4696_v40 = vld [vmem:[#allocation98_spill] sm:$0xff] }
 0x2ac   : > { %v1260_v47 = vpop.permute.xlu0 %1259  ;;  %v1616_v8 = vsel %vm1604_vm11, %v1583_v51, %v4017_v63  ;;  %v1452_v20 = vsel %vm1439_vm6, %v1419_v50, %v4695_v7  ;;  %v400_v62 = vld [vmem:[#allocation2 + $0x198] sm:$0xff] }
 0x2ad   : > { %v1627_v9 = vsel %vm1604_vm11, %v1594_v19, %v1260_v47  ;;  %983 = vrot.lane.b32.xlu2 %v4677_v26, %s2472_s27  ;;  %v1485_v2 = vsel %vm1472_vm7, %v1452_v20, %v4696_v40  ;;  %v4697_v19 = vld [vmem:[#allocation32_spill] sm:$0xff]  ;;  %v4703_v20 = vld [vmem:[#allocation7_spill] sm:$0xff] }
 0x2ae   : > { %v1660_v37 = vsel %vm1637_vm12, %v1627_v9, %v1356_v4  ;;  %v1518_v47 = vsel %vm1505_vm9, %v1485_v2, %v4697_v19  ;;  %v4702_v29 = vld [vmem:[#allocation84_spill] sm:$0xff]  ;;  %v4704_v2 = vld [vmem:[#allocation111_spill] sm:$0xff] }
 0x2af   : > { %2342 = vmatmul.msk.f32.gmra.mxu2 %vm1675_vm13, %v1660_v37  ;;  %v1358_v49 = vpop.permute.xlu2 %1357  ;;  %v401_v37 = vld [vmem:[#allocation2 + $0x1a0] sm:$0xff] }
 0x2b0   : > { %1365 = vrot.lane.b32.xlu1 %v4690_v11, %s2475_s30  ;;  %v635_v39 = vrot.slane %v401_v37, 2 }
 0x2b2   : > { %v1334_v38 = vpop.permute.xlu1 %1333  ;;  %1079 = vrot.lane.b32.xlu0 %v4678_v31, %s2473_s28  ;;  %v4691_v31 = vld [vmem:[#allocation53_spill] sm:$0xff] }
 0x2b3   : > { %v1649_v17 = vsel %vm1637_vm12, %v1616_v8, %v1334_v38  ;;  %v1430_v1 = vsel %vm238_vm0, %v2456_v13, %v4691_v31  ;;  %v630_v38 = vrot.slane %v401_v37, 1  ;;  %v4699_v13 = vld [vmem:[#allocation85_spill] sm:$0xff] }
 0x2b4   : > { %2331 = vmatmul.msk.f32.gmra.mxu0 %vm1675_vm13, %v1649_v17  ;;  %v974_v6 = vpop.permute.xlu0 %973  ;;  %v1463_v45 = vsel %vm1439_vm6, %v1430_v1, %v4692_v5  ;;  %v4700_v1 = vld [vmem:[#allocation105_spill] sm:$0xff] }
 0x2b5   : > { %1271 = vrot.lane.b32.xlu2 %v618_v52, %s2476_s6  ;;  %v1496_v35 = vsel %vm1472_vm7, %v1463_v45, %v4693_v44  ;;  %v4701_v44 = vld [vmem:[#allocation55_spill] sm:$0xff] }
 0x2b6   : > { %v1529_v61 = vsel %vm1505_vm9, %v1496_v35, %v974_v6  ;;  %v2458_v6 = vld [vmem:[#allocation2 + $0x120] sm:$0xff]  ;;  %v1420_v35 = vsel %vm238_vm0, %v3679_v59, %v4701_v44 }
 0x2b7   : > { %v4109_v4 = vpop.permute.xlu2 %1071  ;;  %v1562_v43 = vsel %vm1538_vm8, %v1529_v61, %v4055_v22  ;;  %v1453_v21 = vsel %vm1439_vm6, %v1420_v35, %v4702_v29 }
 0x2b8   : > { %1175 = vrot.lane.b32.xlu1 %v2455_v57, %s2474_s29 }
 0x2ba   : > { %v1048_v63 = vpop.permute.xlu1 %1047  ;;  %1367 = vrot.lane.b32.xlu0 %v623_v48, %s2475_s30 }
 0x2bb   : > { %v1811_v26 = vpop.f32.mrf.mxu0  ;;  %v1551_v9 = vsel %vm1538_vm8, %v1518_v47, %v1048_v63  ;;  %v4698_v63 = vld [vmem:[#allocation69_spill] sm:$0xff] }
 0x2bc   : > { %v1144_v24 = vpop.permute.xlu0 %1143  ;;  %2358 = vmatmul.msk.f32.gmra.mxu1 %vm1637_vm12, %v1811_v26  ;;  %v1431_v26 = vsel %vm238_vm0, %v2458_v6, %v4698_v63 }
 0x2bd   : > { %1081 = vrot.lane.b32.xlu2 %v4690_v11, %s2473_s28  ;;  %v1584_v22 = vsel %vm1571_vm10, %v1551_v9, %v1144_v24  ;;  %v629_v11 = vrot.slane %v400_v62, 1  ;;  %v402_v24 = vld [vmem:[#allocation2 + $0x1a8] sm:$0x3]  ;;  %v1464_v31 = vsel %vm1439_vm6, %v1431_v26, %v4699_v13  ;;  %v4710_v26 = vld [vmem:[#allocation99_spill] sm:$0xff] }
 0x2be   : > { %v1617_v33 = vsel %vm1604_vm11, %v1584_v22, %v4071_v30  ;;  %v1497_v5 = vsel %vm1472_vm7, %v1464_v31, %v4700_v1  ;;  %v637_v7 = vrot.slane %v402_v24, 2  ;;  %v4711_v31 = vld [vmem:[#allocation110_spill] sm:$0xff] }
 0x2bf   : > { %v4125_v28 = vpop.permute.xlu2 %1241  ;;  %v631_v60 = vsel %vm451_vm2, %v629_v11, %v630_v38  ;;  %v4706_v11 = vld [vmem:[#allocation96_spill] sm:$0xff] }
 0x2c0   : > { %985 = vrot.lane.b32.xlu1 %v4684_v56, %s2472_s27  ;;  %v638_v47 = vsel %vm532_vm4, %v635_v39, %v637_v7 }
 0x2c2   : > { %v1166_v18 = vpop.permute.xlu1 %1165  ;;  %1177 = vrot.lane.b32.xlu0 %v2454_v10, %s2474_s29 }
 0x2c3   : > { %v1595_v56 = vsel %vm1571_vm10, %v1562_v43, %v1166_v18  ;;  %v1486_v43 = vsel %vm1472_vm7, %v1453_v21, %v4703_v20  ;;  %v4712_v20 = vld [vmem:[#allocation59_spill] sm:$0xff] }
 0x2c4   : > { %v1262_v16 = vpop.permute.xlu0 %1261 }
 0x2c5   : > { %v1628_v3 = vsel %vm1604_vm11, %v1595_v56, %v1262_v16  ;;  %1369 = vrot.lane.b32.xlu2 %v625_v12, %s2475_s30 }
 0x2c6   : > { %v1661_v32 = vsel %vm1637_vm12, %v1628_v3, %v1358_v49 }
 0x2c7   : > { %v1844_v15 = vpop.f32.mrf.mxu2  ;;  %2343 = vmatmul.msk.f32.gmra.mxu2 %vm1675_vm13, %v1661_v32  ;;  %v1360_v41 = vpop.permute.xlu2 %1359 }
 0x2c8   : > { %1273 = vrot.lane.b32.xlu1 %v620_v42, %s2476_s6  ;;  %2369 = vmatmul.msk.f32.vlgmr.msra.gmra.mxu3 %vm1637_vm12, %v1844_v15 }
 0x2ca   : > { %v1336_v51 = vpop.permute.xlu1 %1335  ;;  %987 = vrot.lane.b32.xlu0 %v618_v52, %s2472_s27  ;;  %v634_v52 = vrot.slane %v400_v62, 2 }
 0x2cb   : > { %v1650_v49 = vsel %vm1637_vm12, %v1617_v33, %v1336_v51  ;;  %v2459_v51 = vld [vmem:[#allocation2 + $0x128] sm:$0xff] }
 0x2cc   : > { %2332 = vmatmul.msk.f32.gmra.mxu0 %vm1675_vm13, %v1650_v49  ;;  %v976_v8 = vpop.permute.xlu0 %975  ;;  %v1814_v10 = vpop.f32.mrf.mxu0  ;;  %v636_v25 = vsel %vm532_vm4, %v634_v52, %v635_v39  ;;  %v4705_v33 = vld [vmem:[#allocation70_spill] sm:$0xff]  ;;  %v4708_v52 = vld [vmem:[#allocation41_spill] sm:$0xff] }
 0x2cd   : > { %2359 = vmatmul.msk.f32.gmra.mxu1 %vm1637_vm12, %v1814_v10  ;;  %1179 = vrot.lane.b32.xlu2 %v400_v62, %s2474_s29  ;;  %v1530_v45 = vsel %vm1505_vm9, %v1497_v5, %v976_v8  ;;  %v1432_v49 = vsel %vm238_vm0, %v2459_v51, %v4705_v33  ;;  %v1421_v39 = vsel %vm238_vm0, %v3729_v34, %v4708_v52  ;;  %v4255_v33 = vld [vmem:[%s4398_s3] ss:$0 sm:$0xff] }
 0x2ce   : > { %v1563_v18 = vsel %vm1538_vm8, %v1530_v45, %v4109_v4 }
 0x2cf   : > { %v1074_v57 = vpop.permute.xlu2 %1073 }
 0x2d0   : > { %1083 = vrot.lane.b32.xlu1 %v623_v48, %s2473_s28  ;;  %v632_v48 = vrot.slane %v402_v24, 1 }
 0x2d2   : > { %v1050_v30 = vpop.permute.xlu1 %1049  ;;  %1275 = vrot.lane.b32.xlu0 %v631_v60, %s2476_s6  ;;  %v633_v23 = vsel %vm451_vm2, %v630_v38, %v632_v48  ;;  %v4707_v38 = vld [vmem:[#allocation100_spill] sm:$0xff] }
 0x2d4   : > { %v1146_v17 = vpop.permute.xlu0 %1145 }
 0x2d5   : > { %989 = vrot.lane.b32.xlu2 %v620_v42, %s2472_s27 }
 0x2d7   : > { %v1244_v50 = vpop.permute.xlu2 %1243 }
 0x2d8   : > { %1371 = vrot.lane.b32.xlu1 %v636_v25, %s2475_s30 }
 0x2d9   : > { %v1847_v14 = vpop.f32.mrf.mxu2 }
 0x2da   : > { %v1168_v61 = vpop.permute.xlu1 %1167  ;;  %1085 = vrot.lane.b32.xlu0 %v625_v12, %s2473_s28  ;;  %2370 = vmatmul.msk.f32.gmra.mxu3 %vm1637_vm12, %v1847_v14  ;;  %v1519_v12 = vsel %vm1505_vm9, %v1486_v43, %v4704_v2  ;;  %v1433_v43 = vsel %vm238_vm0, %v3800_v27, %v4712_v20 }
 0x2db   : > { %v1596_v59 = vsel %vm1571_vm10, %v1563_v18, %v1168_v61  ;;  %v1552_v16 = vsel %vm1538_vm8, %v1519_v12, %v1050_v30 }
 0x2dc   : > { %v1264_v40 = vpop.permute.xlu0 %1263  ;;  %v1585_v4 = vsel %vm1571_vm10, %v1552_v16, %v1146_v17  ;;  %v4709_v17 = vld [vmem:[#allocation86_spill] sm:$0xff] }
 0x2dd   : > { %v1629_v56 = vsel %vm1604_vm11, %v1596_v59, %v1264_v40  ;;  %1277 = vrot.lane.b32.xlu2 %v633_v23, %s2476_s6  ;;  %v1618_v42 = vsel %vm1604_vm11, %v1585_v4, %v4125_v28  ;;  %v1465_v28 = vsel %vm1439_vm6, %v1432_v49, %v4706_v11  ;;  %v1454_v6 = vsel %vm1439_vm6, %v1421_v39, %v4709_v17  ;;  %v4713_v59 = vld [vmem:[#allocation97_spill] sm:$0xff]  ;;  %v4714_v40 = vld [vmem:[#allocation106_spill] sm:$0xff]  ;;  %v4719_v39 = vld [vmem:[#allocation71_spill] sm:$0xff] }
 0x2de   : > { %v1662_v19 = vsel %vm1637_vm12, %v1629_v56, %v1360_v41  ;;  %v1498_v8 = vsel %vm1472_vm7, %v1465_v28, %v4707_v38  ;;  %v1487_v25 = vsel %vm1472_vm7, %v1454_v6, %v4710_v26  ;;  %v4715_v56 = vld [vmem:[#allocation57_spill] sm:$0xff]  ;;  %v4720_v17 = vld [vmem:[#allocation87_spill] sm:$0xff] }
 0x2df   : > { %2344 = vmatmul.msk.f32.gmra.mxu2 %vm1675_vm13, %v1662_v19  ;;  %v1362_v22 = vpop.permute.xlu2 %1361  ;;  %v1520_v48 = vsel %vm1505_vm9, %v1487_v25, %v4711_v31  ;;  %v1422_v16 = vsel %vm238_vm0, %v3785_v46, %v4715_v56  ;;  %v4716_v4 = vld [vmem:[#allocation77_spill] sm:$0xff]  ;;  %v4721_v26 = vld [vmem:[#allocation107_spill] sm:$0xff] }
 0x2e0   : > { %1181 = vrot.lane.b32.xlu1 %v401_v37, %s2474_s29  ;;  %s2389_s29 = sshll.u32 %s4735_s19, 5 }
 0x2e1   : > { %s4378_s7 = scalar_lea.vmem %s4399_s4, %s2389_s29 }
 0x2e2   : > { %v1338_v3 = vpop.permute.xlu1 %1337  ;;  %1373 = vrot.lane.b32.xlu0 %v638_v47, %s2475_s30  ;;  %v1455_v47 = vsel %vm1439_vm6, %v1422_v16, %v4716_v4 }
 0x2e3   : > { %v1651_v9 = vsel %vm1637_vm12, %v1618_v42, %v1338_v3  ;;  %v4717_v42 = vld [vmem:[#allocation101_spill] sm:$0xff] }
 0x2e4   : > { %2333 = vmatmul.msk.f32.gmra.mxu0 %vm1675_vm13, %v1651_v9  ;;  %v978_v32 = vpop.permute.xlu0 %977  ;;  %v1488_v27 = vsel %vm1472_vm7, %v1455_v47, %v4717_v42  ;;  %v4725_v47 = vld [vmem:[#allocation64_spill] sm:$0xff] }
 0x2e5   : > { %v1531_v60 = vsel %vm1505_vm9, %v1498_v8, %v978_v32 }
 0x2e6   : > { %v1564_v63 = vsel %vm1538_vm8, %v1531_v60, %v1074_v57 }
 0x2e7   : > { %v1076_v10 = vpop.permute.xlu2 %1075 }
 0x2e9   : > { %v1817_v15 = vpop.f32.mrf.mxu0 }
 0x2ea   : > { %2360 = vmatmul.msk.f32.gmra.mxu1 %vm1637_vm12, %v1817_v15  ;;  %v1052_v41 = vpop.permute.xlu1 %1051  ;;  %v1850_v62 = vpop.f32.mrf.mxu2 }
 0x2eb   : > { %2371 = vmatmul.msk.f32.gmra.mxu3 %vm1637_vm12, %v1850_v62  ;;  %v1553_v5 = vsel %vm1538_vm8, %v1520_v48, %v1052_v41 }
 0x2ec   : > { %v1148_v37 = vpop.permute.xlu0 %1147 }
 0x2ed   : > { %v1586_v45 = vsel %vm1571_vm10, %v1553_v5, %v1148_v37  ;;  %v2010_v37 = vpop.f32.mrf.mxu1 }
 0x2ee   : > { %v1619_v44 = vsel %vm1604_vm11, %v1586_v45, %v1244_v50  ;;  %v1466_v50 = vsel %vm1439_vm6, %v1433_v43, %v4713_v59  ;;  %v2011_v38 = vadd.f32 %v4255_v33, %v2010_v37 }
 0x2ef   : > { %v1246_v57 = vpop.permute.xlu2 %1245  ;;  %v1499_v2 = vsel %vm1472_vm7, %v1466_v50, %v4714_v40 }
 0x2f2   : > { %v1170_v30 = vpop.permute.xlu1 %1169 }
 0x2f3   : > { %v1597_v24 = vsel %vm1571_vm10, %v1564_v63, %v1170_v30  ;;  %v1434_v30 = vsel %vm238_vm0, %v3883_v36, %v4719_v39  ;;  %v4728_v39 = vld [vmem:[#allocation73_spill] sm:$0xff] }
 0x2f4   : > { %v1266_v13 = vpop.permute.xlu0 %1265  ;;  %v1467_v6 = vsel %vm1439_vm6, %v1434_v30, %v4720_v17  ;;  %v1437_v30 = vsel %vm238_vm0, %v4043_v58, %v4728_v39 }
 0x2f5   : > { %v1630_v1 = vsel %vm1604_vm11, %v1597_v24, %v1266_v13  ;;  %v2013_v60 = vpop.f32.mrf.mxu1  ;;  %v1500_v25 = vsel %vm1472_vm7, %v1467_v6, %v4721_v26  ;;  %v4729_v6 = vld [vmem:[#allocation92_spill] sm:$0xff] }
 0x2f6   : > { %v1663_v34 = vsel %vm1637_vm12, %v1630_v1, %v1362_v22  ;;  %v4718_v22 = vld [vmem:[#allocation112_spill] sm:$0xff]  ;;  %v2014_v31 = vadd.f32 %v4255_v33, %v2013_v60 }
 0x2f7   : > { %2345 = vmatmul.msk.f32.gmra.mxu2 %vm1675_vm13, %v1663_v34  ;;  %v1364_v18 = vpop.permute.xlu2 %1363  ;;  %v1521_v15 = vsel %vm1505_vm9, %v1488_v27, %v4718_v22  ;;  %v4726_v27 = vld [vmem:[#allocation4_spill] sm:$0xff] }
 0x2f8   : > { %v4730_v26 = vld [vmem:[#allocation108_spill] sm:$0xff] }
 0x2fa   : > { %v1340_v14 = vpop.permute.xlu1 %1339 }
 0x2fb   : > { %v1652_v35 = vsel %vm1637_vm12, %v1619_v44, %v1340_v14 }
 0x2fc   : > { %2334 = vmatmul.msk.f32.gmra.mxu0 %vm1675_vm13, %v1652_v35  ;;  %v980_v61 = vpop.permute.xlu0 %979 }
 0x2fd   : > { %v1532_v12 = vsel %vm1505_vm9, %v1499_v2, %v980_v61 }
 0x2fe   : > { %v1565_v3 = vsel %vm1538_vm8, %v1532_v12, %v1076_v10 }
 0x2ff   : > { %v1174_v41 = vpop.permute.xlu2 %1173  ;;  %v2016_v5 = vpop.f32.mrf.mxu1 }
 0x300   : > { %v2017_v44 = vadd.f32 %v4255_v33, %v2016_v5 }
 0x301   : > { %v1820_v23 = vpop.f32.mrf.mxu0 }
 0x302   : > { %2361 = vmatmul.msk.f32.gmra.mxu1 %vm1637_vm12, %v1820_v23  ;;  %v1054_v29 = vpop.permute.xlu1 %1053  ;;  %v1853_v21 = vpop.f32.mrf.mxu2  ;;  %v4722_v23 = vld [vmem:[#allocation72_spill] sm:$0xff] }
 0x303   : > { %2372 = vmatmul.msk.f32.gmra.mxu3 %vm1637_vm12, %v1853_v21  ;;  %v1554_v46 = vsel %vm1538_vm8, %v1521_v15, %v1054_v29  ;;  %v1435_v29 = vsel %vm238_vm0, %v3937_v0, %v4722_v23  ;;  %v4723_v21 = vld [vmem:[#allocation3_spill] sm:$0xff]  ;;  %v4727_v15 = vld [vmem:[#allocation30_spill] sm:$0xff] }
 0x304   : > { %v1150_v7 = vpop.permute.xlu0 %1149  ;;  %v4731_v23 = vld [vmem:[#allocation75_spill] sm:$0xff] }
 0x305   : > { %v1587_v49 = vsel %vm1571_vm10, %v1554_v46, %v1150_v7  ;;  %v4724_v7 = vld [vmem:[#allocation102_spill] sm:$0xff] }
 0x306   : > { %v1620_v28 = vsel %vm1604_vm11, %v1587_v49, %v1246_v57 }
 0x307   : > { %v984_v52 = vpop.permute.xlu2 %983 }
 0x308   : > { %v2019_v43 = vpop.f32.mrf.mxu1 }
 0x309   : > { %v2020_v2 = vadd.f32 %v4255_v33, %v2019_v43 }
 0x30a   : > { %v1172_v19 = vpop.permute.xlu1 %1171 }
 0x30b   : > { %v1598_v9 = vsel %vm1571_vm10, %v1565_v3, %v1172_v19  ;;  %v1436_v3 = vsel %vm238_vm0, %v3989_v54, %v4725_v47 }
 0x30c   : > { %v1268_v32 = vpop.permute.xlu0 %1267 }
 0x30d   : > { %v1631_v62 = vsel %vm1604_vm11, %v1598_v9, %v1268_v32  ;;  %v1469_v9 = vsel %vm1439_vm6, %v1436_v3, %v4726_v27 }
 0x30e   : > { %v1664_v51 = vsel %vm1637_vm12, %v1631_v62, %v1364_v18  ;;  %v1468_v18 = vsel %vm1439_vm6, %v1435_v29, %v4723_v21  ;;  %v1438_v29 = vsel %vm238_vm0, %v4063_v53, %v4731_v23  ;;  %v4732_v21 = vld [vmem:[#allocation5_spill] sm:$0xff] }
 0x30f   : > { %2346 = vmatmul.msk.f32.gmra.mxu2 %vm1675_vm13, %v1664_v51  ;;  %v1272_v45 = vpop.permute.xlu2 %1271  ;;  %v1501_v20 = vsel %vm1472_vm7, %v1468_v18, %v4724_v7  ;;  %v1471_v18 = vsel %vm1439_vm6, %v1438_v29, %v4732_v21  ;;  %v4733_v7 = vld [vmem:[#allocation103_spill] sm:$0xff] }
 0x310   : > { %v1534_v59 = vsel %vm1505_vm9, %v1501_v20, %v984_v52  ;;  %v1504_v20 = vsel %vm1472_vm7, %v1471_v18, %v4733_v7 }
 0x311   : > { %v2022_v4 = vpop.f32.mrf.mxu1 }
 0x312   : > { %v1342_v11 = vpop.permute.xlu1 %1341  ;;  %v2023_v62 = vadd.f32 %v4255_v33, %v2022_v4 }
 0x313   : > { %v1653_v8 = vsel %vm1637_vm12, %v1620_v28, %v1342_v11 }
 0x314   : > { %2335 = vmatmul.msk.f32.gmra.mxu0 %vm1675_vm13, %v1653_v8  ;;  %v982_v10 = vpop.permute.xlu0 %981 }
 0x315   : > { %2106 = vxpose.xlu1.b32.start [1/16] (narrow) %v2011_v38, 16  ;;  %v1533_v48 = vsel %vm1505_vm9, %v1500_v25, %v982_v10 }
 0x317   : > { %v1082_v12 = vpop.permute.xlu2 %1081 }
 0x319   : > { %v1823_v63 = vpop.f32.mrf.mxu0 }
 0x31a   : > { %2362 = vmatmul.msk.f32.gmra.mxu1 %vm1637_vm12, %v1823_v63  ;;  %v1078_v24 = vpop.permute.xlu1 %1077  ;;  %v1856_v13 = vpop.f32.mrf.mxu2  ;;  %v1470_v63 = vsel %vm1439_vm6, %v1437_v30, %v4729_v6 }
 0x31b   : > { %2373 = vmatmul.msk.f32.gmra.mxu3 %vm1637_vm12, %v1856_v13  ;;  %v1566_v1 = vsel %vm1538_vm8, %v1533_v48, %v1078_v24  ;;  %v1503_v25 = vsel %vm1472_vm7, %v1470_v63, %v4730_v26 }
 0x31c   : > { %v1270_v36 = vpop.permute.xlu0 %1269  ;;  %v1599_v34 = vsel %vm1571_vm10, %v1566_v1, %v1174_v41  ;;  %v1502_v41 = vsel %vm1472_vm7, %v1469_v9, %v4727_v15 }
 0x31d   : > { %2107 = vxpose.xlu1.b32.cont [2/16] (narrow) %v2014_v31, 16  ;;  %v1632_v57 = vsel %vm1604_vm11, %v1599_v34, %v1270_v36 }
 0x31f   : > { %v1370_v51 = vpop.permute.xlu2 %1369 }
 0x322   : > { %v1366_v14 = vpop.permute.xlu1 %1365 }
 0x323   : > { %v1665_v35 = vsel %vm1637_vm12, %v1632_v57, %v1366_v14 }
 0x324   : > { %2347 = vmatmul.msk.f32.gmra.mxu2 %vm1675_vm13, %v1665_v35  ;;  %v1080_v61 = vpop.permute.xlu0 %1079 }
 0x325   : > { %2108 = vxpose.xlu1.b32.cont [3/16] (narrow) %v2017_v44, 16  ;;  %v1567_v50 = vsel %vm1538_vm8, %v1534_v59, %v1080_v61 }
 0x327   : > { %v2025_v49 = vpop.f32.mrf.mxu1  ;;  %v1180_v52 = vpop.permute.xlu2 %1179 }
 0x328   : > { %v2026_v38 = vadd.f32 %v4255_v33, %v2025_v49 }
 0x32a   : > { %v1176_v40 = vpop.permute.xlu1 %1175 }
 0x32b   : > { %v1600_v56 = vsel %vm1571_vm10, %v1567_v50, %v1176_v40 }
 0x32c   : > { %v1368_v16 = vpop.permute.xlu0 %1367  ;;  %v1633_v0 = vsel %vm1604_vm11, %v1600_v56, %v1272_v45 }
 0x32d   : > { %2109 = vxpose.xlu1.b32.cont [4/16] (narrow) %v2020_v2, 16  ;;  %v1666_v19 = vsel %vm1637_vm12, %v1633_v0, %v1368_v16 }
 0x32e   : > { %2348 = vmatmul.msk.f32.gmra.mxu2 %vm1675_vm13, %v1666_v19 }
 0x32f   : > { %v990_v5 = vpop.permute.xlu2 %989 }
 0x330   : > { %v1537_v43 = vsel %vm1505_vm9, %v1504_v20, %v990_v5 }
 0x331   : > { %v1826_v42 = vpop.f32.mrf.mxu0 }
 0x332   : > { %2363 = vmatmul.msk.f32.gmra.mxu1 %vm1637_vm12, %v1826_v42  ;;  %v986_v32 = vpop.permute.xlu1 %985  ;;  %v1859_v22 = vpop.f32.mrf.mxu2 }
 0x333   : > { %2374 = vmatmul.msk.f32.gmra.mxu3 %vm1637_vm12, %v1859_v22  ;;  %v1535_v37 = vsel %vm1505_vm9, %v1502_v41, %v986_v32 }
 0x334   : > { %v1178_v46 = vpop.permute.xlu0 %1177  ;;  %v1568_v54 = vsel %vm1538_vm8, %v1535_v37, %v1082_v12 }
 0x335   : > { %2110 = vxpose.xlu1.b32.cont [5/16] (narrow) %v2023_v62, 16  ;;  %v1601_v11 = vsel %vm1571_vm10, %v1568_v54, %v1178_v46 }
 0x337   : > { %v1278_v59 = vpop.permute.xlu2 %1277 }
 0x339   : > { %v2028_v17 = vpop.f32.mrf.mxu1 }
 0x33a   : > { %v1274_v28 = vpop.permute.xlu1 %1273  ;;  %v2029_v13 = vadd.f32 %v4255_v33, %v2028_v17 }
 0x33b   : > { %v1634_v8 = vsel %vm1604_vm11, %v1601_v11, %v1274_v28 }
 0x33c   : > { %v988_v10 = vpop.permute.xlu0 %987  ;;  %v1667_v60 = vsel %vm1637_vm12, %v1634_v8, %v1370_v51 }
 0x33d   : > { %2111 = vxpose.xlu1.b32.cont [6/16] (narrow) %v2026_v38, 16  ;;  %2349 = vmatmul.msk.f32.gmra.mxu2 %vm1675_vm13, %v1667_v60  ;;  %v1536_v31 = vsel %vm1505_vm9, %v1503_v25, %v988_v10 }
 0x342   : > { %v1084_v24 = vpop.permute.xlu1 %1083 }
 0x343   : > { %v1569_v48 = vsel %vm1538_vm8, %v1536_v31, %v1084_v24 }
 0x344   : > { %v1276_v1 = vpop.permute.xlu0 %1275  ;;  %v1602_v36 = vsel %vm1571_vm10, %v1569_v48, %v1180_v52 }
 0x345   : > { %2112 = vxpose.xlu1.b32.cont [7/16] (narrow) %v2029_v13, 16  ;;  %v1635_v34 = vsel %vm1604_vm11, %v1602_v36, %v1276_v1 }
 0x349   : > { %v1829_v58 = vpop.f32.mrf.mxu0 }
 0x34a   : > { %2364 = vmatmul.msk.f32.gmra.mxu1 %vm1637_vm12, %v1829_v58  ;;  %v1372_v45 = vpop.permute.xlu1 %1371  ;;  %v1862_v57 = vpop.f32.mrf.mxu2 }
 0x34b   : > { %v2031_v14 = vpop.f32.mrf.mxu1  ;;  %v1668_v44 = vsel %vm1637_vm12, %v1635_v34, %v1372_v45  ;;  %2375 = vmatmul.msk.f32.gmra.mxu3 %vm1637_vm12, %v1862_v57  ;;  %v2061_v17 = vpop.f32.mrf.mxu3 }
 0x34c   : > { %v2032_v35 = vadd.f32 %v4255_v33, %v2031_v14  ;;  %2350 = vmatmul.msk.f32.gmra.mxu2 %vm1675_vm13, %v1668_v44  ;;  %v1086_v61 = vpop.permute.xlu0 %1085  ;;  %v2062_v6 = vadd.f32 %v4255_v33, %v2061_v17 }
 0x34d   : > { %v1570_v50 = vsel %vm1538_vm8, %v1537_v43, %v1086_v61 }
 0x34e   : > { %2113 = vxpose.xlu1.b32.cont [8/16] (narrow) %v2032_v35, 16 }
 0x352   : > { %v1182_v40 = vpop.permute.xlu1 %1181 }
 0x353   : > { %v1603_v2 = vsel %vm1571_vm10, %v1570_v50, %v1182_v40 }
 0x354   : > { %v1636_v12 = vsel %vm1604_vm11, %v1603_v2, %v1278_v59  ;;  %v1374_v56 = vpop.permute.xlu0 %1373 }
 0x355   : > { %v1669_v53 = vsel %vm1637_vm12, %v1636_v12, %v1374_v56 }
 0x356   : > { %2351 = vmatmul.msk.f32.gmra.mxu2 %vm1675_vm13, %v1669_v53 }
 0x35d   : > { %v2064_v63 = vpop.f32.mrf.mxu3 }
 0x35e   : > { %v2065_v26 = vadd.f32 %v4255_v33, %v2064_v63 }
 0x361   : > { %v1832_v16 = vpop.f32.mrf.mxu0 }
 0x362   : > { %2365 = vmatmul.msk.f32.gmra.mxu1 %vm1637_vm12, %v1832_v16  ;;  %v1865_v0 = vpop.f32.mrf.mxu2 }
 0x363   : > { %2376 = vmatmul.msk.f32.gmra.mxu3 %vm1637_vm12, %v1865_v0 }
 0x367   : > { %v2034_v19 = vpop.f32.mrf.mxu1 }
 0x368   : > { %v2035_v4 = vadd.f32 %v4255_v33, %v2034_v19 }
 0x36a   : > { %2114 = vxpose.xlu1.b32.cont [9/16] (narrow) %v2035_v4, 16 }
 0x36e   : > { %v2067_v25 = vpop.f32.mrf.mxu3 }
 0x36f   : > { %v2068_v24 = vadd.f32 %v4255_v33, %v2067_v25 }
 0x379   : > { %v1835_v47 = vpop.f32.mrf.mxu0 }
 0x37a   : > { %2366 = vmatmul.msk.f32.gmra.mxu1 %vm1637_vm12, %v1835_v47  ;;  %v1868_v3 = vpop.f32.mrf.mxu2 }
 0x37b   : > { %2377 = vmatmul.msk.f32.gmra.mxu3 %vm1637_vm12, %v1868_v3 }
 0x37f   : > { %v2037_v42 = vpop.f32.mrf.mxu1 }
 0x380   : > { %v2038_v27 = vadd.f32 %v4255_v33, %v2037_v42 }
 0x382   : > { %2115 = vxpose.xlu1.b32.cont [10/16] (narrow) %v2038_v27, 16 }
 0x386   : > { %v2070_v13 = vpop.f32.mrf.mxu3 }
 0x387   : > { %v2071_v31 = vadd.f32 %v4255_v33, %v2070_v13 }
 0x391   : > { %v1838_v9 = vpop.f32.mrf.mxu0 }
 0x392   : > { %2367 = vmatmul.msk.f32.gmra.mxu1 %vm1637_vm12, %v1838_v9  ;;  %v1871_v32 = vpop.f32.mrf.mxu2 }
 0x393   : > { %2378 = vmatmul.msk.f32.gmra.mxu3 %vm1637_vm12, %v1871_v32 }
 0x397   : > { %v2040_v22 = vpop.f32.mrf.mxu1 }
 0x398   : > { %v2041_v15 = vadd.f32 %v4255_v33, %v2040_v22 }
 0x39a   : > { %2116 = vxpose.xlu1.b32.cont [11/16] (narrow) %v2041_v15, 16  ;;  %2368 = vmatmul.msk.f32.gmra.mxu1 %vm1637_vm12, %v4123_v55 }
 0x39e   : > { %v2073_v48 = vpop.f32.mrf.mxu3 }
 0x39f   : > { %v2074_v1 = vadd.f32 %v4255_v33, %v2073_v48 }
 0x3a7   : > { %v1874_v41 = vpop.f32.mrf.mxu2 }
 0x3a8   : > { %2379 = vmatmul.msk.f32.gmra.mxu3 %vm1637_vm12, %v1874_v41 }
 0x3af   : > { %v2043_v62 = vpop.f32.mrf.mxu1 }
 0x3b0   : > { %v2044_v37 = vadd.f32 %v4255_v33, %v2043_v62 }
 0x3b1   : > { %v1877_v46 = vpop.f32.mrf.mxu2 }
 0x3b2   : > { %2117 = vxpose.xlu1.b32.cont [12/16] (narrow) %v2044_v37, 16  ;;  %2380 = vmatmul.msk.f32.gmra.mxu3 %vm1637_vm12, %v1877_v46 }
 0x3b6   : > { %v2076_v36 = vpop.f32.mrf.mxu3 }
 0x3b7   : > { %v2077_v5 = vadd.f32 %v4255_v33, %v2076_v36 }
 0x3c0   : > { %v1880_v51 = vpop.f32.mrf.mxu2 }
 0x3c1   : > { %2381 = vmatmul.msk.f32.gmra.mxu3 %vm1637_vm12, %v1880_v51 }
 0x3c7   : > { %v2046_v54 = vpop.f32.mrf.mxu1 }
 0x3c8   : > { %v2047_v49 = vadd.f32 %v4255_v33, %v2046_v54 }
 0x3ca   : > { %2118 = vxpose.xlu1.b32.cont [13/16] (narrow) %v2047_v49, 16 }
 0x3ce   : > { %v2079_v58 = vpop.f32.mrf.mxu3 }
 0x3cf   : > { %v1883_v11 = vpop.f32.mrf.mxu2  ;;  %v2080_v34 = vadd.f32 %v4255_v33, %v2079_v58 }
 0x3d0   : > { %2382 = vmatmul.msk.f32.gmra.mxu3 %vm1637_vm12, %v1883_v11 }
 0x3d9   : > { %v1886_v55 = vpop.f32.mrf.mxu2 }
 0x3da   : > { %2383 = vmatmul.msk.f32.gmra.mxu3 %vm1637_vm12, %v1886_v55 }
 0x3df   : > { %v2049_v28 = vpop.f32.mrf.mxu1 }
 0x3e0   : > { %v2050_v38 = vadd.f32 %v4255_v33, %v2049_v28 }
 0x3e2   : > { %2119 = vxpose.xlu1.b32.cont [14/16] (narrow) %v2050_v38, 16 }
 0x3e6   : > { %v2082_v45 = vpop.f32.mrf.mxu3 }
 0x3e7   : > { %v2083_v57 = vadd.f32 %v4255_v33, %v2082_v45 }
 0x3f7   : > { %v2052_v8 = vpop.f32.mrf.mxu1 }
 0x3f8   : > { %v2053_v10 = vadd.f32 %v4255_v33, %v2052_v8 }
 0x3fa   : > { %2120 = vxpose.xlu1.b32.cont [15/16] (narrow) %v2053_v10, 16 }
 0x3fe   : > { %v2085_v14 = vpop.f32.mrf.mxu3 }
 0x3ff   : > { %v2086_v44 = vadd.f32 %v4255_v33, %v2085_v14 }
 0x40f   : > { %v2055_v60 = vpop.f32.mrf.mxu1 }
 0x410   : > { %v2056_v52 = vadd.f32 %v4255_v33, %v2055_v60 }
 0x412   : > { %2121 = vxpose.xlu1.b32.end [16/16] (narrow) %v2056_v52, 16 }
 0x416   : > { %v2088_v35 = vpop.f32.mrf.mxu3 }
 0x417   : > { %v2058_v39 = vpop.f32.mrf.mxu1  ;;  %v2089_v61 = vadd.f32 %v4255_v33, %v2088_v35 }
 0x418   : > { %v2059_v30 = vadd.f32 %v4255_v33, %v2058_v39 }
 0x41a   : > { %2138 = vxpose.xlu2.b32.start [1/16] (narrow) %v2059_v30, 16 }
 0x422   : > { %2139 = vxpose.xlu2.b32.cont [2/16] (narrow) %v2062_v6, 16 }
 0x42a   : > { %2140 = vxpose.xlu2.b32.cont [3/16] (narrow) %v2065_v26, 16 }
 0x42b   : > { %v2091_v23 = vpop.f32.mrf.mxu3 }
 0x42c   : > { %v2092_v29 = vadd.f32 %v4255_v33, %v2091_v23 }
 0x432   : > { %2141 = vxpose.xlu2.b32.cont [4/16] (narrow) %v2068_v24, 16 }
 0x435   : > { %v2094_v18 = vpop.f32.mrf.mxu3 }
 0x436   : > { %v2095_v7 = vadd.f32 %v4255_v33, %v2094_v18 }
 0x43a   : > { %2142 = vxpose.xlu2.b32.cont [5/16] (narrow) %v2071_v31, 16 }
 0x43e   : > { %v2122_v21 = vpop.trf.xlu1 }
 0x43f   : > { %2170 = vst [vmem:[%s4378_s7] sm:$0xff] %v2122_v21 }
 0x442   : > { %2143 = vxpose.xlu2.b32.cont [6/16] (narrow) %v2074_v1, 16 }
 0x444   : > { %v2097_v59 = vpop.f32.mrf.mxu3 }
 0x445   : > { %v2098_v50 = vadd.f32 %v4255_v33, %v2097_v59 }
 0x446   : > { %v2123_v20 = vpop.trf.xlu1 }
 0x447   : > { %2172 = vst [vmem:[%s4378_s7 + $0x10] sm:$0xf] %v2123_v20  ;;  %v2384_v43 = vmul.f32 -1.442695, %v2123_v20 }
 0x449   : > { %2418 = vpow2.f32 %v2384_v43 }
 0x44a   : > { %2144 = vxpose.xlu2.b32.cont [7/16] (narrow) %v2077_v5, 16 }
 0x44f   : > { %v2419_v40 = vpop.eup %2418 }
 0x450   : > { %v2180_v2 = vadd.f32 1.0, %v2419_v40 }
 0x452   : > { %2145 = vxpose.xlu2.b32.cont [8/16] (narrow) %v2080_v34, 16  ;;  %2420 = vrcp.f32 %v2180_v2  ;;  %v2193_v19 = vand.u32 2147483648, %v2180_v2  ;;  %vm2187_vm14 = vweird.f32 %v2180_v2  ;;  %v2191_v47 = vand.u32 2147483647, %v2180_v2 }
 0x453   : > { %v2100_v12 = vpop.f32.mrf.mxu3 }
 0x454   : > { %v2101_v56 = vadd.f32 %v4255_v33, %v2100_v12  ;;  %v2194_v27 = vor.u32 1.1754944e-38, %v2193_v19  ;;  %vm2192_vm1 = vcmp.eq.f32.partialorder %v2191_v47, 8.507059e+37 }
 0x458   : > { %v2421_v53 = vpop.eup %2420 }
 0x459   : > { %v2183_v0 = vmul.f32 %v2421_v53, %v2180_v2  ;;  %vm2188_vm15 = vweird.f32 %v2421_v53 }
 0x45a   : > { %2146 = vxpose.xlu2.b32.cont [9/16] (narrow) %v2083_v57, 16  ;;  %vm2189_vm0 = vmor %vm2187_vm14, %vm2188_vm15 }
 0x45b   : > { %v2184_v4 = vsub.f32 1.0, %v2183_v0 }
 0x45d   : > { %v2103_v16 = vpop.f32.mrf.mxu3  ;;  %v2185_v42 = vmul.f32 %v2421_v53, %v2184_v4 }
 0x45e   : > { %v2104_v3 = vadd.f32 %v4255_v33, %v2103_v16 }
 0x45f   : > { %v2186_v9 = vadd.f32 %v2421_v53, %v2185_v42 }
 0x461   : > { %v2190_v32 = vsel %vm2189_vm0, %v2421_v53, %v2186_v9 }
 0x462   : > { %2147 = vxpose.xlu2.b32.cont [10/16] (narrow) %v2086_v44, 16  ;;  %v2195_v22 = vsel %vm2192_vm1, %v2194_v27, %v2190_v32 }
 0x463   : > { %2214 = vst.sshfl [vmem:[#allocation1] sm:$0xff pattern:$0x75316420] %v2195_v22 }
 0x46a   : > { %2148 = vxpose.xlu2.b32.cont [11/16] (narrow) %v2089_v61, 16 }
 0x472   : > { %2149 = vxpose.xlu2.b32.cont [12/16] (narrow) %v2092_v29, 16 }
 0x47a   : > { %2150 = vxpose.xlu2.b32.cont [13/16] (narrow) %v2095_v7, 16 }
 0x482   : > { %2151 = vxpose.xlu2.b32.cont [14/16] (narrow) %v2098_v50, 16 }
 0x48a   : > { %2152 = vxpose.xlu2.b32.cont [15/16] (narrow) %v2101_v56, 16 }
 0x492   : > { %2153 = vxpose.xlu2.b32.end [16/16] (narrow) %v2104_v3, 16 }
 0x4b3   : > { %v2154_v15 = vpop.trf.xlu2 }
 0x4b4   : > { %2171 = vst [vmem:[%s4378_s7 + $0x8] sm:$0xff] %v2154_v15 }
 0x4bb   : > { %v2155_v41 = vpop.trf.xlu2 }
 0x4bc   : > { %2173 = vst [vmem:[%s4378_s7 + $0x18] sm:$0xf] %v2155_v41  ;;  %v2385_v62 = vmul.f32 -1.442695, %v2155_v41 }
 0x4be   : > { %2422 = vpow2.f32 %v2385_v62 }
 0x4c4   : > { %v2423_v37 = vpop.eup %2422 }
 0x4c5   : > { %v2181_v46 = vadd.f32 1.0, %v2423_v37 }
 0x4c7   : > { %2424 = vrcp.f32 %v2181_v46  ;;  %v2208_v49 = vand.u32 2147483648, %v2181_v46  ;;  %v2206_v55 = vand.u32 2147483647, %v2181_v46  ;;  %vm2202_vm3 = vweird.f32 %v2181_v46 }
 0x4c9   : > { %v2209_v38 = vor.u32 1.1754944e-38, %v2208_v49  ;;  %vm2207_vm5 = vcmp.eq.f32.partialorder %v2206_v55, 8.507059e+37 }
 0x4cd   : > { %v2425_v33 = vpop.eup %2424 }
 0x4ce   : > { %v2198_v51 = vmul.f32 %v2425_v33, %v2181_v46  ;;  %vm2203_vm2 = vweird.f32 %v2425_v33 }
 0x4cf   : > { %vm2204_vm4 = vmor %vm2202_vm3, %vm2203_vm2 }
 0x4d0   : > { %v2199_v54 = vsub.f32 1.0, %v2198_v51 }
 0x4d2   : > { %v2200_v11 = vmul.f32 %v2425_v33, %v2199_v54 }
 0x4d4   : > { %v2201_v28 = vadd.f32 %v2425_v33, %v2200_v11 }
 0x4d6   : > { %v2205_v8 = vsel %vm2204_vm4, %v2425_v33, %v2201_v28 }
 0x4d7   : > { %v2210_v10 = vsel %vm2207_vm5, %v2209_v38, %v2205_v8 }
 0x4d8   : > { %2215 = vst.sshfl [vmem:[#allocation1 + $0x8] sm:$0xff pattern:$0x75316420] %v2210_v10 }
 0x4df   : > { %v2217_v60 = vld [vmem:[#allocation1 + $0x1] ss:$2 sm:$0xff] }
 0x4e0   : > { %2219 = vst [vmem:[%s237_s11] sm:$0x77] %v2217_v60 }
 0x4e1 PF: > { %s16_s18 = sadd.s32 1, %s2466_s18  }
 0x4e2   : > { %p13_p4 = scmp.ge.s32.totalorder %s16_s18, 4  }
 0x4e4   :  { %15 = sbr.rel (!%p13_p4) target bundleno = 1 (0x1), region = 81 }

</bundles_post_ra>
